<compile_context>
chip_gen: v7x
topology: tpu7x:2x2x1
jax: 0.10.0
libtpu: 0.0.40
codegen_flags: <defaults>
</compile_context>

<pallas_src>
import math
import functools

import jax
import jax.numpy as jnp
from jax.experimental import pallas as pl
from jax.experimental.pallas import tpu as pltpu


def _round_up(x, m):
    return ((x + m - 1) // m) * m


def _vmem_limit_bytes():
    cap = 128 * 1024 * 1024
    try:
        info = pltpu.get_tpu_info()
        cap = int(getattr(info, 'vmem_capacity_bytes', cap))
    except Exception:
        pass
    # ~96 MiB on 128-MiB parts (v5e/v6e), ~48 MiB on 64-MiB parts (v7x).
    return int(min(96 * 1024 * 1024, (cap * 3) // 4))


# ----------------------------------------------------------------------------
# In-kernel helpers
# ----------------------------------------------------------------------------
def _layer_norm(y, gamma, beta, eps=1e-5):
    """LayerNorm over the last axis (f32 statistics)."""
    mu = jnp.mean(y, axis=-1, keepdims=True)
    var = jnp.mean((y - mu) ** 2, axis=-1, keepdims=True)
    return (y - mu) * jax.lax.rsqrt(var + eps) * gamma + beta


# ----------------------------------------------------------------------------
# Fused encoder stack.  grid = (batch, layer):
#   axis 0 "parallel"  : batch block (megacore sharding on v7x)
#   axis 1 "arbitrary" : layer; the output block index is constant along it, so the
#                        activation stays resident in VMEM across all layers.
# ----------------------------------------------------------------------------
def encoder_stack_kernel(x_ref, wqkv_ref, wo_ref, w1_ref, w2_ref, vec_ref,
                         out_ref, *, nhead):
    layer = pl.program_id(1)
    S, D = out_ref.shape
    H = nhead
    hd = D // H
    F = w1_ref.shape[-1]
    scale = 1.0 / math.sqrt(hd)

    # Layer 0: seed the resident activation carrier with the embedded input.
    @pl.when(layer == 0)
    def _():
        out_ref[...] = x_ref[...]

    # Packed per-layer bias / LayerNorm vectors: static lane slices of ONE DMA'd slab.
    bqkv = vec_ref[:, 0:3 * D]
    bo = vec_ref[:, 3 * D:4 * D]
    g1 = vec_ref[:, 4 * D:5 * D]
    be1 = vec_ref[:, 5 * D:6 * D]
    b1 = vec_ref[:, 6 * D:6 * D + F]
    b2 = vec_ref[:, 6 * D + F:7 * D + F]
    g2 = vec_ref[:, 7 * D + F:8 * D + F]
    be2 = vec_ref[:, 8 * D + F:9 * D + F]

    x = out_ref[...]                                    # (S, D) f32 carrier
    xb = x.astype(jnp.bfloat16)

    # ---- fused QKV projection: one (S, D) @ (D, 3D) MXU matmul ------------------
    qkv = jnp.dot(xb, wqkv_ref[...], preferred_element_type=jnp.float32) + bqkv

    # 1/sqrt(hd) folded into q (O(S*D) multiplies, not O(H*S^2)).
    q = jnp.transpose((qkv[:, 0:D] * scale).reshape(S, H, hd),
                      (1, 0, 2)).astype(jnp.bfloat16)            # (H, S, hd)
    k = jnp.transpose(qkv[:, D:2 * D].reshape(S, H, hd),
                      (1, 0, 2)).astype(jnp.bfloat16)
    v = jnp.transpose(qkv[:, 2 * D:3 * D].reshape(S, H, hd),
                      (1, 0, 2)).astype(jnp.bfloat16)

    # ---- head-batched scaled dot-product attention (no mask, f32 stats) ---------
    s = jnp.einsum('hqd,hkd->hqk', q, k, preferred_element_type=jnp.float32)
    m = jnp.max(s, axis=-1, keepdims=True)
    p = jnp.exp(s - m)
    l = jnp.sum(p, axis=-1, keepdims=True)                        # (H, S, 1)

    ctx = jnp.einsum('hqk,hkd->hqd', p.astype(jnp.bfloat16), v,
                     preferred_element_type=jnp.float32)          # (H, S, hd)
    # Normalize the (H, S, hd) context instead of the (H, S, S) probabilities.
    ctx = ctx * pl.reciprocal(l, approx=True)
    ctx2 = jnp.transpose(ctx, (1, 0, 2)).reshape(S, D)            # head-major lanes

    # ---- output projection: heads folded into one (S, D) @ (D, D) matmul --------
    attn = jnp.dot(ctx2.astype(jnp.bfloat16), wo_ref[...],
                   preferred_element_type=jnp.float32) + bo

    # ---- residual + LayerNorm 1 (post-LN; dropout = identity in eval) -----------
    y = _layer_norm(x + attn, g1, be1)

    # ---- feed-forward: linear1 -> ReLU -> linear2 -------------------------------
    h1 = jnp.dot(y.astype(jnp.bfloat16), w1_ref[...],
                 preferred_element_type=jnp.float32) + b1
    h1 = jnp.maximum(h1, 0.0)
    ffn = jnp.dot(h1.astype(jnp.bfloat16), w2_ref[...],
                  preferred_element_type=jnp.float32) + b2

    # ---- residual + LayerNorm 2; write the carrier back -------------------------
    out_ref[...] = _layer_norm(y + ffn, g2, be2)


# ----------------------------------------------------------------------------
# Final vocab projection, tiled over a lane-dense (128-multiple) vocab axis.
# ----------------------------------------------------------------------------
def output_proj_kernel(x_ref, w_ref, b_ref, o_ref):
    o_ref[...] = (jnp.dot(x_ref[...].astype(jnp.bfloat16), w_ref[...],
                          preferred_element_type=jnp.float32)
                  + b_ref[...]).astype(o_ref.dtype)


# ----------------------------------------------------------------------------
# JAX glue
# ----------------------------------------------------------------------------
def positional_encoding(seq_len, d_model):
    position = jnp.arange(seq_len, dtype=jnp.float32)[:, None]
    div_term = jnp.exp(jnp.arange(0, d_model, 2, dtype=jnp.float32)
                       * (-math.log(10000.0) / d_model))
    pe = jnp.zeros((seq_len, d_model), jnp.float32)
    pe = pe.at[:, 0::2].set(jnp.sin(position * div_term))
    pe = pe.at[:, 1::2].set(jnp.cos(position * div_term))
    return pe


def init_params(key, vocab_size, d_model, nhead, num_layers, dim_feedforward,
                vocab_tile):
    """Parameters in kernel-ready layout: matmul weights pre-transposed and bf16,
    QKV fused into one (D, 3D) slab, all bias/LN vectors concatenated into one slab,
    per-layer tensors stacked along a leading layer axis."""
    D, F, L = d_model, dim_feedforward, num_layers
    vocab_pad = _round_up(vocab_size, vocab_tile)
    keys = jax.random.split(key, 2 + L)

    emb = jax.random.uniform(keys[0], (vocab_size, D), jnp.float32, -0.1, 0.1)

    # nn.Linear(d_model, vocab): weight (V, D).  Stored transposed + zero-padded.
    out_w = jax.random.uniform(keys[1], (vocab_size, D), jnp.float32, -0.1, 0.1)
    out_w_t = jnp.zeros((D, vocab_pad), jnp.float32).at[:, :vocab_size].set(out_w.T)
    out_b = jnp.zeros((1, vocab_pad), jnp.float32)

    def one_layer(k):
        ks = jax.random.split(k, 4)
        in_proj_w = 0.05 * jax.random.normal(ks[0], (3 * D, D), jnp.float32)
        in_proj_b = jnp.zeros((3 * D,), jnp.float32)
        w_o = 0.05 * jax.random.normal(ks[1], (D, D), jnp.float32)
        w_1 = 0.05 * jax.random.normal(ks[2], (F, D), jnp.float32)
        w_2 = 0.05 * jax.random.normal(ks[3], (D, F), jnp.float32)
        vec = jnp.concatenate([
            in_proj_b,                        # bqkv  (3D)
            jnp.zeros((D,), jnp.float32),     # bo
            jnp.ones((D,), jnp.float32),      # gamma1
            jnp.zeros((D,), jnp.float32),     # beta1
            jnp.zeros((F,), jnp.float32),     # b1
            jnp.zeros((D,), jnp.float32),     # b2
            jnp.ones((D,), jnp.float32),      # gamma2
            jnp.zeros((D,), jnp.float32),     # beta2
        ])[None, :]                           # (1, 9D + F)
        return dict(wqkv=in_proj_w.T,         # (D, 3D), cols ordered [q | k | v]
                    wo=w_o.T,                 # (D, D)
                    w1=w_1.T,                 # (D, F)
                    w2=w_2.T,                 # (F, D)
                    vec=vec)

    per_layer = [one_layer(keys[2 + l]) for l in range(L)]
    layers = {n: jnp.stack([p[n] for p in per_layer]) for n in per_layer[0]}
    for n in ('wqkv', 'wo', 'w1', 'w2'):      # MXU operands in bf16
        layers[n] = layers[n].astype(jnp.bfloat16)

    return dict(embedding=emb, out_w=out_w_t.astype(jnp.bfloat16), out_b=out_b,
                layers=layers)


def transformer_forward(src, params, *, d_model, nhead):
    B, S = src.shape
    D = d_model
    vocab_size = params['embedding'].shape[0]
    vocab_pad = params['out_w'].shape[-1]
    L = params['layers']['wqkv'].shape[0]
    Fdim = params['layers']['w1'].shape[-1]
    H = nhead

    # Embedding gather + sqrt(d_model) scale + positional encoding (fused under jit).
    x = params['embedding'][src] * math.sqrt(D)                   # (B, S, D)
    x = x + positional_encoding(S, D)[None, :, :]

    weights = [params['layers'][n] for n in ('wqkv', 'wo', 'w1', 'w2', 'vec')]

    def layer_spec(arr):   # per-layer block of an (L, ...) stacked tensor
        return pl.BlockSpec((None,) + tuple(arr.shape[1:]), lambda b, l: (l, 0, 0))

    act_spec = pl.BlockSpec((None, S, D), lambda b, l: (b, 0, 0))

    # Advisory cost estimate for the fused encoder call.
    flops = int(L * B * (2 * S * D * (4 * D + 2 * Fdim) + 4 * S * S * D))
    transcendentals = int(L * B * (H * S * S + H * S + 2 * S))
    bytes_accessed = int(B * sum(w.size * w.dtype.itemsize for w in weights)
                         + 2 * B * S * D * 4)

    x = pl.pallas_call(
        functools.partial(encoder_stack_kernel, nhead=nhead),
        grid=(B, L),
        in_specs=[act_spec] + [layer_spec(w) for w in weights],
        out_specs=act_spec,
        out_shape=jax.ShapeDtypeStruct((B, S, D), jnp.float32),
        input_output_aliases={0: 0},          # donate the embedded input buffer
        compiler_params=pltpu.CompilerParams(
            dimension_semantics=("parallel", "arbitrary"),
            vmem_limit_bytes=_vmem_limit_bytes()),
        cost_estimate=pl.CostEstimate(flops=flops,
                                      transcendentals=transcendentals,
                                      bytes_accessed=bytes_accessed),
    )(x, *weights)

    # PyTorch: output[-1] over the sequence axis -> (B, D)
    x_last = x[:, -1, :]

    TN = min(512, vocab_pad)                  # lane-dense tile, multiple of 128
    assert vocab_pad % TN == 0
    logits_padded = pl.pallas_call(
        output_proj_kernel,
        grid=(vocab_pad // TN,),
        in_specs=[pl.BlockSpec((B, D), lambda j: (0, 0)),
                  pl.BlockSpec((D, TN), lambda j: (0, j)),
                  pl.BlockSpec((1, TN), lambda j: (0, j))],
        out_specs=pl.BlockSpec((B, TN), lambda j: (0, j)),
        out_shape=jax.ShapeDtypeStruct((B, vocab_pad), jnp.float32),
        compiler_params=pltpu.CompilerParams(dimension_semantics=("parallel",)),
    )(x_last, params['out_w'], params['out_b'])

    return logits_padded[:, :vocab_size]


if __name__ == "__main__":
    vocab_size = 50
    d_model = 32
    nhead = 4
    num_layers = 2
    dim_feedforward = 64
    batch, seq = 2, 8

    vocab_tile = min(512, _round_up(vocab_size, 128))

    key = jax.random.PRNGKey(0)
    k_tok, k_param = jax.random.split(key)

    src = jax.random.randint(k_tok, (batch, seq), 0, vocab_size, dtype=jnp.int32)
    params = init_params(k_param, vocab_size, d_model, nhead, num_layers,
                         dim_feedforward, vocab_tile)

    forward = jax.jit(functools.partial(transformer_forward,
                                        d_model=d_model, nhead=nhead))
    logits = forward(src, params)
    logits = jax.block_until_ready(logits)

    assert logits.shape == (batch, vocab_size)
    assert bool(jnp.all(jnp.isfinite(logits)))
    print("KERNEL_OK")
</pallas_src>

<mosaic_0001>
module attributes {stable_mosaic.version = 11 : i64} {
  func.func @encoder_stack_kernel(%arg0: i32, %arg1: i32, %arg2: memref<1x8x32xf32, #tpu.memory_space<vmem>>, %arg3: memref<1x32x96xbf16, #tpu.memory_space<vmem>>, %arg4: memref<1x32x32xbf16, #tpu.memory_space<vmem>>, %arg5: memref<1x32x64xbf16, #tpu.memory_space<vmem>>, %arg6: memref<1x64x32xbf16, #tpu.memory_space<vmem>>, %arg7: memref<1x1x352xf32, #tpu.memory_space<vmem>>, %arg8: memref<1x8x32xf32, #tpu.memory_space<vmem>>) attributes {dimension_semantics = [#tpu.dimension_semantics<parallel>, #tpu.dimension_semantics<arbitrary>], iteration_bounds = array<i64: 2, 2>, scalar_prefetch = 0 : i64, scratch_operands = 0 : i64, tpu.core_type = #tpu.core_type<tc>, window_params = [{transform_indices = @transform_0, window_bounds = array<i64: 1, 8, 32>}, {transform_indices = @transform_1, window_bounds = array<i64: 1, 32, 96>}, {transform_indices = @transform_2, window_bounds = array<i64: 1, 32, 32>}, {transform_indices = @transform_3, window_bounds = array<i64: 1, 32, 64>}, {transform_indices = @transform_4, window_bounds = array<i64: 1, 64, 32>}, {transform_indices = @transform_5, window_bounds = array<i64: 1, 1, 352>}, {transform_indices = @transform_6, window_bounds = array<i64: 1, 8, 32>}]} {
    %c0_i32 = arith.constant 0 : i32
    %0 = arith.cmpi eq, %arg1, %c0_i32 : i32
    %1 = arith.extui %0 : i1 to i32
    %c0_i32_0 = arith.constant 0 : i32
    %2 = arith.cmpi ne, %1, %c0_i32_0 : i32
    scf.if %2 {
      %c0_54 = arith.constant 0 : index
      %c0_55 = arith.constant 0 : index
      %c0_56 = arith.constant 0 : index
      %125 = vector.load %arg2[%c0_54, %c0_55, %c0_56] : memref<1x8x32xf32, #tpu.memory_space<vmem>>, vector<1x8x32xf32>
      %126 = vector.shape_cast %125 : vector<1x8x32xf32> to vector<8x32xf32>
      %c0_57 = arith.constant 0 : index
      %c0_58 = arith.constant 0 : index
      %c0_59 = arith.constant 0 : index
      %127 = vector.load %arg8[%c0_57, %c0_58, %c0_59] : memref<1x8x32xf32, #tpu.memory_space<vmem>>, vector<1x8x32xf32>
      %128 = vector.shape_cast %127 : vector<1x8x32xf32> to vector<8x32xf32>
      %129 = vector.shape_cast %126 : vector<8x32xf32> to vector<1x8x32xf32>
      tpu.vector_store %arg8[%c0_57, %c0_58, %c0_59], %129 {strides = array<i32>} : memref<1x8x32xf32, #tpu.memory_space<vmem>>, vector<1x8x32xf32>,
    } else {
    }
    %c0 = arith.constant 0 : index
    %c0_1 = arith.constant 0 : index
    %c0_2 = arith.constant 0 : index
    %3 = vector.load %arg7[%c0, %c0_1, %c0_2] : memref<1x1x352xf32, #tpu.memory_space<vmem>>, vector<1x1x96xf32>
    %4 = vector.shape_cast %3 : vector<1x1x96xf32> to vector<1x96xf32>
    %c0_3 = arith.constant 0 : index
    %c0_4 = arith.constant 0 : index
    %c96 = arith.constant 96 : index
    %5 = vector.load %arg7[%c0_3, %c0_4, %c96] : memref<1x1x352xf32, #tpu.memory_space<vmem>>, vector<1x1x32xf32>
    %6 = vector.shape_cast %5 : vector<1x1x32xf32> to vector<1x32xf32>
    %c0_5 = arith.constant 0 : index
    %c0_6 = arith.constant 0 : index
    %c128 = arith.constant 128 : index
    %7 = vector.load %arg7[%c0_5, %c0_6, %c128] : memref<1x1x352xf32, #tpu.memory_space<vmem>>, vector<1x1x32xf32>
    %8 = vector.shape_cast %7 : vector<1x1x32xf32> to vector<1x32xf32>
    %c0_7 = arith.constant 0 : index
    %c0_8 = arith.constant 0 : index
    %c160 = arith.constant 160 : index
    %9 = vector.load %arg7[%c0_7, %c0_8, %c160] : memref<1x1x352xf32, #tpu.memory_space<vmem>>, vector<1x1x32xf32>
    %10 = vector.shape_cast %9 : vector<1x1x32xf32> to vector<1x32xf32>
    %c0_9 = arith.constant 0 : index
    %c0_10 = arith.constant 0 : index
    %c192 = arith.constant 192 : index
    %11 = vector.load %arg7[%c0_9, %c0_10, %c192] : memref<1x1x352xf32, #tpu.memory_space<vmem>>, vector<1x1x64xf32>
    %12 = vector.shape_cast %11 : vector<1x1x64xf32> to vector<1x64xf32>
    %c0_11 = arith.constant 0 : index
    %c0_12 = arith.constant 0 : index
    %c256 = arith.constant 256 : index
    %13 = vector.load %arg7[%c0_11, %c0_12, %c256] : memref<1x1x352xf32, #tpu.memory_space<vmem>>, vector<1x1x32xf32>
    %14 = vector.shape_cast %13 : vector<1x1x32xf32> to vector<1x32xf32>
    %c0_13 = arith.constant 0 : index
    %c0_14 = arith.constant 0 : index
    %c288 = arith.constant 288 : index
    %15 = vector.load %arg7[%c0_13, %c0_14, %c288] : memref<1x1x352xf32, #tpu.memory_space<vmem>>, vector<1x1x32xf32>
    %16 = vector.shape_cast %15 : vector<1x1x32xf32> to vector<1x32xf32>
    %c0_15 = arith.constant 0 : index
    %c0_16 = arith.constant 0 : index
    %c320 = arith.constant 320 : index
    %17 = vector.load %arg7[%c0_15, %c0_16, %c320] : memref<1x1x352xf32, #tpu.memory_space<vmem>>, vector<1x1x32xf32>
    %18 = vector.shape_cast %17 : vector<1x1x32xf32> to vector<1x32xf32>
    %c0_17 = arith.constant 0 : index
    %c0_18 = arith.constant 0 : index
    %c0_19 = arith.constant 0 : index
    %19 = vector.load %arg8[%c0_17, %c0_18, %c0_19] : memref<1x8x32xf32, #tpu.memory_space<vmem>>, vector<1x8x32xf32>
    %20 = vector.shape_cast %19 : vector<1x8x32xf32> to vector<8x32xf32>
    %21 = arith.truncf %20 : vector<8x32xf32> to vector<8x32xbf16>
    %c0_20 = arith.constant 0 : index
    %c0_21 = arith.constant 0 : index
    %c0_22 = arith.constant 0 : index
    %22 = vector.load %arg3[%c0_20, %c0_21, %c0_22] : memref<1x32x96xbf16, #tpu.memory_space<vmem>>, vector<1x32x96xbf16>
    %23 = vector.shape_cast %22 : vector<1x32x96xbf16> to vector<32x96xbf16>
    %cst = arith.constant dense<0.000000e+00> : vector<8x96xf32>
    %24 = tpu.matmul %21, %23, %cst {dimension_numbers = #tpu.dot_dimension_numbers<[1], [0], [0], [1], [0, 0, 1, 1], [], []>} : vector<8x32xbf16>, vector<32x96xbf16>, vector<8x96xf32> -> vector<8x96xf32>
    %25 = vector.broadcast %4 : vector<1x96xf32> to vector<8x96xf32>
    %26 = arith.addf %24, %25 : vector<8x96xf32>
    %27 = vector.extract_strided_slice %26 {offsets = [0, 0], sizes = [8, 32], strides = [1, 1]} : vector<8x96xf32> to vector<8x32xf32>
    %cst_23 = arith.constant 0.353553385 : f32
    %28 = vector.broadcast %cst_23 : f32 to vector<8x32xf32>
    %29 = arith.mulf %27, %28 : vector<8x32xf32>
    %30 = vector.shape_cast %29 : vector<8x32xf32> to vector<8x4x8xf32>
    %31 = tpu.transpose %30, [1, 0, 2] : vector<8x4x8xf32> -> vector<4x8x8xf32>
    %32 = arith.truncf %31 : vector<4x8x8xf32> to vector<4x8x8xbf16>
    %33 = vector.extract_strided_slice %26 {offsets = [0, 32], sizes = [8, 32], strides = [1, 1]} : vector<8x96xf32> to vector<8x32xf32>
    %34 = vector.shape_cast %33 : vector<8x32xf32> to vector<8x4x8xf32>
    %35 = tpu.transpose %34, [1, 0, 2] : vector<8x4x8xf32> -> vector<4x8x8xf32>
    %36 = arith.truncf %35 : vector<4x8x8xf32> to vector<4x8x8xbf16>
    %37 = vector.extract_strided_slice %26 {offsets = [0, 64], sizes = [8, 32], strides = [1, 1]} : vector<8x96xf32> to vector<8x32xf32>
    %38 = vector.shape_cast %37 : vector<8x32xf32> to vector<8x4x8xf32>
    %39 = tpu.transpose %38, [1, 0, 2] : vector<8x4x8xf32> -> vector<4x8x8xf32>
    %40 = arith.truncf %39 : vector<4x8x8xf32> to vector<4x8x8xbf16>
    "tpu.trace_start"() <{level = 10 : i32, message = "hqd,hkd->hqk"}> : () -> ()
    %cst_24 = arith.constant dense<0.000000e+00> : vector<4x8x8xf32>
    %41 = tpu.matmul %32, %36, %cst_24 {dimension_numbers = #tpu.dot_dimension_numbers<[2], [2], [1], [1], [0, 0, 0, 1, 1, 1], [0], [0]>} : vector<4x8x8xbf16>, vector<4x8x8xbf16>, vector<4x8x8xf32> -> vector<4x8x8xf32>
    "tpu.trace_stop"() : () -> ()
    %cst_25 = arith.constant dense<0xFF800000> : vector<4x8xf32>
    %42 = vector.multi_reduction <maximumf>, %41, %cst_25 [2] : vector<4x8x8xf32> to vector<4x8xf32>
    %43 = vector.shape_cast %42 : vector<4x8xf32> to vector<4x8x1xf32>
    %44 = vector.broadcast %43 : vector<4x8x1xf32> to vector<4x8x8xf32>
    %45 = arith.subf %41, %44 : vector<4x8x8xf32>
    %46 = math.exp %45 : vector<4x8x8xf32>
    %cst_26 = arith.constant dense<0.000000e+00> : vector<4x8xf32>
    %47 = vector.multi_reduction <add>, %46, %cst_26 [2] : vector<4x8x8xf32> to vector<4x8xf32>
    %48 = vector.shape_cast %47 : vector<4x8xf32> to vector<4x8x1xf32>
    %49 = arith.truncf %46 : vector<4x8x8xf32> to vector<4x8x8xbf16>
    "tpu.trace_start"() <{level = 10 : i32, message = "hqk,hkd->hqd"}> : () -> ()
    %cst_27 = arith.constant dense<0.000000e+00> : vector<4x8x8xf32>
    %50 = tpu.matmul %49, %40, %cst_27 {dimension_numbers = #tpu.dot_dimension_numbers<[2], [1], [1], [2], [0, 0, 0, 1, 1, 2], [0], [0]>} : vector<4x8x8xbf16>, vector<4x8x8xbf16>, vector<4x8x8xf32> -> vector<4x8x8xf32>
    "tpu.trace_stop"() : () -> ()
    %51 = tpu.reciprocal %48 {approx = true} : vector<4x8x1xf32> -> vector<4x8x1xf32>
    %52 = vector.broadcast %51 : vector<4x8x1xf32> to vector<4x8x8xf32>
    %53 = arith.mulf %50, %52 : vector<4x8x8xf32>
    %54 = tpu.transpose %53, [1, 0, 2] : vector<4x8x8xf32> -> vector<8x4x8xf32>
    %55 = vector.shape_cast %54 : vector<8x4x8xf32> to vector<8x32xf32>
    %56 = arith.truncf %55 : vector<8x32xf32> to vector<8x32xbf16>
    %c0_28 = arith.constant 0 : index
    %c0_29 = arith.constant 0 : index
    %c0_30 = arith.constant 0 : index
    %57 = vector.load %arg4[%c0_28, %c0_29, %c0_30] : memref<1x32x32xbf16, #tpu.memory_space<vmem>>, vector<1x32x32xbf16>
    %58 = vector.shape_cast %57 : vector<1x32x32xbf16> to vector<32x32xbf16>
    %cst_31 = arith.constant dense<0.000000e+00> : vector<8x32xf32>
    %59 = tpu.matmul %56, %58, %cst_31 {dimension_numbers = #tpu.dot_dimension_numbers<[1], [0], [0], [1], [0, 0, 1, 1], [], []>} : vector<8x32xbf16>, vector<32x32xbf16>, vector<8x32xf32> -> vector<8x32xf32>
    %60 = vector.broadcast %6 : vector<1x32xf32> to vector<8x32xf32>
    %61 = arith.addf %59, %60 : vector<8x32xf32>
    %62 = arith.addf %20, %61 : vector<8x32xf32>
    %cst_32 = arith.constant dense<0.000000e+00> : vector<8xf32>
    %63 = vector.multi_reduction <add>, %62, %cst_32 [1] : vector<8x32xf32> to vector<8xf32>
    %64 = vector.shape_cast %63 : vector<8xf32> to vector<8x1xf32>
    %cst_33 = arith.constant 3.200000e+01 : f32
    %65 = vector.broadcast %cst_33 : f32 to vector<8x1xf32>
    %66 = arith.divf %64, %65 : vector<8x1xf32>
    %67 = vector.broadcast %66 : vector<8x1xf32> to vector<8x32xf32>
    %68 = arith.subf %62, %67 : vector<8x32xf32>
    %69 = arith.mulf %68, %68 : vector<8x32xf32>
    %cst_34 = arith.constant dense<0.000000e+00> : vector<8xf32>
    %70 = vector.multi_reduction <add>, %69, %cst_34 [1] : vector<8x32xf32> to vector<8xf32>
    %71 = vector.shape_cast %70 : vector<8xf32> to vector<8x1xf32>
    %cst_35 = arith.constant 3.200000e+01 : f32
    %72 = vector.broadcast %cst_35 : f32 to vector<8x1xf32>
    %73 = arith.divf %71, %72 : vector<8x1xf32>
    %74 = vector.broadcast %66 : vector<8x1xf32> to vector<8x32xf32>
    %75 = arith.subf %62, %74 : vector<8x32xf32>
    %cst_36 = arith.constant 9.99999974E-6 : f32
    %76 = vector.broadcast %cst_36 : f32 to vector<8x1xf32>
    %77 = arith.addf %73, %76 : vector<8x1xf32>
    %78 = math.rsqrt %77 : vector<8x1xf32>
    %79 = vector.broadcast %78 : vector<8x1xf32> to vector<8x32xf32>
    %80 = arith.mulf %75, %79 : vector<8x32xf32>
    %81 = vector.broadcast %8 : vector<1x32xf32> to vector<8x32xf32>
    %82 = arith.mulf %80, %81 : vector<8x32xf32>
    %83 = vector.broadcast %10 : vector<1x32xf32> to vector<8x32xf32>
    %84 = arith.addf %82, %83 : vector<8x32xf32>
    %85 = arith.truncf %84 : vector<8x32xf32> to vector<8x32xbf16>
    %c0_37 = arith.constant 0 : index
    %c0_38 = arith.constant 0 : index
    %c0_39 = arith.constant 0 : index
    %86 = vector.load %arg5[%c0_37, %c0_38, %c0_39] : memref<1x32x64xbf16, #tpu.memory_space<vmem>>, vector<1x32x64xbf16>
    %87 = vector.shape_cast %86 : vector<1x32x64xbf16> to vector<32x64xbf16>
    %cst_40 = arith.constant dense<0.000000e+00> : vector<8x64xf32>
    %88 = tpu.matmul %85, %87, %cst_40 {dimension_numbers = #tpu.dot_dimension_numbers<[1], [0], [0], [1], [0, 0, 1, 1], [], []>} : vector<8x32xbf16>, vector<32x64xbf16>, vector<8x64xf32> -> vector<8x64xf32>
    %89 = vector.broadcast %12 : vector<1x64xf32> to vector<8x64xf32>
    %90 = arith.addf %88, %89 : vector<8x64xf32>
    %cst_41 = arith.constant 0.000000e+00 : f32
    %91 = vector.broadcast %cst_41 : f32 to vector<8x64xf32>
    %92 = arith.maximumf %90, %91 : vector<8x64xf32>
    %93 = arith.truncf %92 : vector<8x64xf32> to vector<8x64xbf16>
    %c0_42 = arith.constant 0 : index
    %c0_43 = arith.constant 0 : index
    %c0_44 = arith.constant 0 : index
    %94 = vector.load %arg6[%c0_42, %c0_43, %c0_44] : memref<1x64x32xbf16, #tpu.memory_space<vmem>>, vector<1x64x32xbf16>
    %95 = vector.shape_cast %94 : vector<1x64x32xbf16> to vector<64x32xbf16>
    %cst_45 = arith.constant dense<0.000000e+00> : vector<8x32xf32>
    %96 = tpu.matmul %93, %95, %cst_45 {dimension_numbers = #tpu.dot_dimension_numbers<[1], [0], [0], [1], [0, 0, 1, 1], [], []>} : vector<8x64xbf16>, vector<64x32xbf16>, vector<8x32xf32> -> vector<8x32xf32>
    %97 = vector.broadcast %14 : vector<1x32xf32> to vector<8x32xf32>
    %98 = arith.addf %96, %97 : vector<8x32xf32>
    %99 = arith.addf %84, %98 : vector<8x32xf32>
    %cst_46 = arith.constant dense<0.000000e+00> : vector<8xf32>
    %100 = vector.multi_reduction <add>, %99, %cst_46 [1] : vector<8x32xf32> to vector<8xf32>
    %101 = vector.shape_cast %100 : vector<8xf32> to vector<8x1xf32>
    %cst_47 = arith.constant 3.200000e+01 : f32
    %102 = vector.broadcast %cst_47 : f32 to vector<8x1xf32>
    %103 = arith.divf %101, %102 : vector<8x1xf32>
    %104 = vector.broadcast %103 : vector<8x1xf32> to vector<8x32xf32>
    %105 = arith.subf %99, %104 : vector<8x32xf32>
    %106 = arith.mulf %105, %105 : vector<8x32xf32>
    %cst_48 = arith.constant dense<0.000000e+00> : vector<8xf32>
    %107 = vector.multi_reduction <add>, %106, %cst_48 [1] : vector<8x32xf32> to vector<8xf32>
    %108 = vector.shape_cast %107 : vector<8xf32> to vector<8x1xf32>
    %cst_49 = arith.constant 3.200000e+01 : f32
    %109 = vector.broadcast %cst_49 : f32 to vector<8x1xf32>
    %110 = arith.divf %108, %109 : vector<8x1xf32>
    %111 = vector.broadcast %103 : vector<8x1xf32> to vector<8x32xf32>
    %112 = arith.subf %99, %111 : vector<8x32xf32>
    %cst_50 = arith.constant 9.99999974E-6 : f32
    %113 = vector.broadcast %cst_50 : f32 to vector<8x1xf32>
    %114 = arith.addf %110, %113 : vector<8x1xf32>
    %115 = math.rsqrt %114 : vector<8x1xf32>
    %116 = vector.broadcast %115 : vector<8x1xf32> to vector<8x32xf32>
    %117 = arith.mulf %112, %116 : vector<8x32xf32>
    %118 = vector.broadcast %16 : vector<1x32xf32> to vector<8x32xf32>
    %119 = arith.mulf %117, %118 : vector<8x32xf32>
    %120 = vector.broadcast %18 : vector<1x32xf32> to vector<8x32xf32>
    %121 = arith.addf %119, %120 : vector<8x32xf32>
    %c0_51 = arith.constant 0 : index
    %c0_52 = arith.constant 0 : index
    %c0_53 = arith.constant 0 : index
    %122 = vector.load %arg8[%c0_51, %c0_52, %c0_53] : memref<1x8x32xf32, #tpu.memory_space<vmem>>, vector<1x8x32xf32>
    %123 = vector.shape_cast %122 : vector<1x8x32xf32> to vector<8x32xf32>
    %124 = vector.shape_cast %121 : vector<8x32xf32> to vector<1x8x32xf32>
    tpu.vector_store %arg8[%c0_51, %c0_52, %c0_53], %124 {strides = array<i32>} : memref<1x8x32xf32, #tpu.memory_space<vmem>>, vector<1x8x32xf32>,
    return
  }
  func.func @transform_0(%arg0: i32, %arg1: i32) -> (i32, i32, i32) {
    %c0_i32 = arith.constant 0 : i32
    %c0_i32_0 = arith.constant 0 : i32
    %c0_i32_1 = arith.constant 0 : i32
    return %arg0, %c0_i32, %c0_i32_0 : i32, i32, i32
  }
  func.func @transform_1(%arg0: i32, %arg1: i32) -> (i32, i32, i32) {
    %c0_i32 = arith.constant 0 : i32
    %c0_i32_0 = arith.constant 0 : i32
    %c0_i32_1 = arith.constant 0 : i32
    return %arg1, %c0_i32, %c0_i32_0 : i32, i32, i32
  }
  func.func @transform_2(%arg0: i32, %arg1: i32) -> (i32, i32, i32) {
    %c0_i32 = arith.constant 0 : i32
    %c0_i32_0 = arith.constant 0 : i32
    %c0_i32_1 = arith.constant 0 : i32
    return %arg1, %c0_i32, %c0_i32_0 : i32, i32, i32
  }
  func.func @transform_3(%arg0: i32, %arg1: i32) -> (i32, i32, i32) {
    %c0_i32 = arith.constant 0 : i32
    %c0_i32_0 = arith.constant 0 : i32
    %c0_i32_1 = arith.constant 0 : i32
    return %arg1, %c0_i32, %c0_i32_0 : i32, i32, i32
  }
  func.func @transform_4(%arg0: i32, %arg1: i32) -> (i32, i32, i32) {
    %c0_i32 = arith.constant 0 : i32
    %c0_i32_0 = arith.constant 0 : i32
    %c0_i32_1 = arith.constant 0 : i32
    return %arg1, %c0_i32, %c0_i32_0 : i32, i32, i32
  }
  func.func @transform_5(%arg0: i32, %arg1: i32) -> (i32, i32, i32) {
    %c0_i32 = arith.constant 0 : i32
    %c0_i32_0 = arith.constant 0 : i32
    %c0_i32_1 = arith.constant 0 : i32
    return %arg1, %c0_i32, %c0_i32_0 : i32, i32, i32
  }
  func.func @transform_6(%arg0: i32, %arg1: i32) -> (i32, i32, i32) {
    %c0_i32 = arith.constant 0 : i32
    %c0_i32_0 = arith.constant 0 : i32
    %c0_i32_1 = arith.constant 0 : i32
    return %arg0, %c0_i32, %c0_i32_0 : i32, i32, i32
  }
}

module attributes {stable_mosaic.version = 11 : i64} {
  func.func @output_proj_kernel(%arg0: i32, %arg1: memref<2x32xf32, #tpu.memory_space<vmem>>, %arg2: memref<32x128xbf16, #tpu.memory_space<vmem>>, %arg3: memref<1x128xf32, #tpu.memory_space<vmem>>, %arg4: memref<2x128xf32, #tpu.memory_space<vmem>>) attributes {dimension_semantics = [#tpu.dimension_semantics<parallel>], iteration_bounds = array<i64: 1>, scalar_prefetch = 0 : i64, scratch_operands = 0 : i64, tpu.core_type = #tpu.core_type<tc>, window_params = [{pipeline_mode = #tpu.pipeline_mode<synchronous>, transform_indices = @transform_0, window_bounds = array<i64: 2, 32>}, {transform_indices = @transform_1, window_bounds = array<i64: 32, 128>}, {transform_indices = @transform_2, window_bounds = array<i64: 1, 128>}, {transform_indices = @transform_3, window_bounds = array<i64: 2, 128>}]} {
    %c0 = arith.constant 0 : index
    %c0_0 = arith.constant 0 : index
    %0 = vector.load %arg1[%c0, %c0_0] : memref<2x32xf32, #tpu.memory_space<vmem>>, vector<2x32xf32>
    %1 = arith.truncf %0 : vector<2x32xf32> to vector<2x32xbf16>
    %c0_1 = arith.constant 0 : index
    %c0_2 = arith.constant 0 : index
    %2 = vector.load %arg2[%c0_1, %c0_2] : memref<32x128xbf16, #tpu.memory_space<vmem>>, vector<32x128xbf16>
    %cst = arith.constant dense<0.000000e+00> : vector<2x128xf32>
    %3 = tpu.matmul %1, %2, %cst {dimension_numbers = #tpu.dot_dimension_numbers<[1], [0], [0], [1], [0, 0, 1, 1], [], []>} : vector<2x32xbf16>, vector<32x128xbf16>, vector<2x128xf32> -> vector<2x128xf32>
    %c0_3 = arith.constant 0 : index
    %c0_4 = arith.constant 0 : index
    %4 = vector.load %arg3[%c0_3, %c0_4] : memref<1x128xf32, #tpu.memory_space<vmem>>, vector<1x128xf32>
    %5 = vector.broadcast %4 : vector<1x128xf32> to vector<2x128xf32>
    %6 = arith.addf %3, %5 : vector<2x128xf32>
    %c0_5 = arith.constant 0 : index
    %c0_6 = arith.constant 0 : index
    %7 = vector.load %arg4[%c0_5, %c0_6] : memref<2x128xf32, #tpu.memory_space<vmem>>, vector<2x128xf32>
    tpu.vector_store %arg4[%c0_5, %c0_6], %6 {strides = array<i32>} : memref<2x128xf32, #tpu.memory_space<vmem>>, vector<2x128xf32>,
    return
  }
  func.func @transform_0(%arg0: i32) -> (i32, i32) {
    %c0_i32 = arith.constant 0 : i32
    %c0_i32_0 = arith.constant 0 : i32
    %c0_i32_1 = arith.constant 0 : i32
    return %c0_i32, %c0_i32_0 : i32, i32
  }
  func.func @transform_1(%arg0: i32) -> (i32, i32) {
    %c0_i32 = arith.constant 0 : i32
    %c0_i32_0 = arith.constant 0 : i32
    return %c0_i32, %arg0 : i32, i32
  }
  func.func @transform_2(%arg0: i32) -> (i32, i32) {
    %c0_i32 = arith.constant 0 : i32
    %c0_i32_0 = arith.constant 0 : i32
    return %c0_i32, %arg0 : i32, i32
  }
  func.func @transform_3(%arg0: i32) -> (i32, i32) {
    %c0_i32 = arith.constant 0 : i32
    %c0_i32_0 = arith.constant 0 : i32
    return %c0_i32, %arg0 : i32, i32
  }
}

</mosaic_0001>

<bundles_post_ra>
// kernel: transformer_forward.3
= control target key start
LH: loop header
LB: loop body
LE: loop exit
PB: predicated region body
PF: predicated region fallthrough
CT: control target
= control target key end

     0   :  { %8 = vsyncpa [#allocation3], 0  ;;  %s242_s0 = inlined_call_operand.vmem [shape: f32[2,32], index: 0, kind: input, shape index: {}]   ;;  %s243_s1 = inlined_call_operand.hbm [shape: bf16[32,128], index: 1, kind: input, shape index: {}]   ;;  %s244_s2 = inlined_call_operand.vmem [shape: f32[1,128], index: 2, kind: input, shape index: {}]   ;;  %s245_s3 = inlined_call_operand.hbm [shape: f32[2,128], index: 3, kind: output, shape index: {}]  }
   0x1   :  { %9 = vsyncpa [#allocation4], 0  ;;  %s186_s12 = smov [#allocation2]   ;;  %s138_s16 = scalar_lea.hbm %s243_s1, 256 }
   0x2   :  { %s17_s13 = sshll.u32 %s186_s12, 4  ;;  %p139_p0 = scmp.ne.s32.totalorder %s243_s1, %s138_s16  ;;  %s18_s13 = int_to_ptr.vmem [resolvable:$true] %s17_s13 }
   0x3   :  { %p142_p1 = scmp.lt.u32.totalorder %s138_s16, %s243_s1 }
   0x5   :  { %p144_p2 = pnand %p142_p1, %p139_p0 }
   0x7   :  { %147 = shalt.err (!%p144_p2)
}
   0x8   :  { %s148_s21 = scalar_lea.vmem %s18_s13, 256  ;;  %p153_p4 = scmp.lt.s32.totalorder %s18_s13, %s18_s13 }
   0x9   :  { %p149_p3 = scmp.ne.s32.totalorder %s18_s13, %s148_s21  ;;  %p154_p5 = scmp.lt.s32.totalorder %s148_s21, %s148_s21 }
   0xb   :  { %p155_p6 = por %p154_p5, %p153_p4 }
   0xd   :  { %p156_p7 = pnand %p155_p6, %p149_p3 }
   0xf   :  { %159 = shalt.err (!%p156_p7)
}
  0x10   :  { %s187_s22 = smov 64   ;;  %s188_s23 = smov 4  }
  0x11   :  { %23 = dma.hbm_to_vmem [thread:$0]  %s243_s1, 256, %s18_s13, [#allocation3], %s187_s22, %s187_s22, %s188_s23  }
  0x12   :  { %182 = dma.done.wait [#allocation3], 256  }
  0x13   :  { %183 = vsyncadd [#allocation3], 4294967040  ;;  %v189_v0 = vmov 0.0   ;;  %vm190_vm0 = vmmov 0   ;;  %v136_v1 = vld [vmem:[#allocation2] sm:$0xff]   ;;  %v137_v2 = vld [vmem:[#allocation2 + $0x8] sm:$0xff]  }
  0x14   :  { %122 = vmatprep.subr.bf16.mxu0 %v189_v0  ;;  %126 = vmatprep.mubr.msk.bf16.mxu0 %vm190_vm0, %v189_v0  ;;  %v30_v3 = vld [vmem:[%s242_s0] sm:$0x3]  ;;  %vm55_vm1 = vcmask 261120   ;;  %s191_s29 = smov [#allocation5]  }
  0x15   :  { %123 = vmatpush3.bf16.msra.mxu0 %v136_v1  ;;  %v31_v4 = vpack.c.bf16 %v30_v3, %v30_v3  ;;  %v115_v5 = vld [vmem:[%s244_s2] ss:$0 sm:$0xff]  ;;  %s106_s30 = sshll.u32 %s191_s29, 4  ;;  %s107_s30 = int_to_ptr.vmem [resolvable:$true] %s106_s30 }
  0x16   :  { %124 = vmatprep.subr.bf16.mxu0 %v189_v0  ;;  %s160_s4 = scalar_lea.vmem %s107_s30, 32  ;;  %p165_p9 = scmp.lt.s32.totalorder %s107_s30, %s107_s30 }
  0x17   :  { %p161_p8 = scmp.ne.s32.totalorder %s107_s30, %s160_s4  ;;  %p166_p10 = scmp.lt.s32.totalorder %s160_s4, %s160_s4 }
  0x19   :  { %125 = vmatpush3.bf16.msra.mxu0 %v137_v2  ;;  %p167_p11 = por %p166_p10, %p165_p9 }
  0x1b   :  { %p168_p12 = pnand %p167_p11, %p161_p8 }
  0x1c   :  { %127 = vmatmul.mubr.msk.bf16.vlgmr.msra.gmra.mrb[0].mxu0 %vm55_vm1, %v31_v4 }
  0xef   :  { %v93_v6 = vpop.f32.mrb[0].mxu0 }
  0xf0   :  { %v94_v7 = vadd.f32 %v115_v5, %v93_v6  ;;  %v128_v8 = vpop.f32.mrb[1].mxu0 }
  0xf1   :  { %v96_v9 = vpop.f32.mrb[2].mxu0 }
  0xf2   :  { %99 = vst [vmem:[#allocation5] sm:$0x3] %v94_v7  ;;  %v129_v10 = vpop.f32.mrb[3].mxu0 }
  0xf3   :  { %171 = shalt.err (!%p168_p12)
}
  0xf4   :  { %s172_s2 = scalar_lea.hbm %s245_s3, 32 }
  0xf5   :  { %p173_p13 = scmp.ne.s32.totalorder %s245_s3, %s172_s2  ;;  %p176_p0 = scmp.lt.u32.totalorder %s172_s2, %s245_s3 }
  0xf7   :  { %p178_p1 = pnand %p176_p0, %p173_p13 }
  0xf9   :  { %181 = shalt.err (!%p178_p1)
}
  0xfa   :  { %109 = dma.vmem_to_hbm [thread:$0]  %s107_s30, 32, %s245_s3, [#allocation4]  }
  0xfb   :  { %184 = dma.done.wait [#allocation4], 32  }
  0xfc   :  { %185 = vsyncadd [#allocation4], 4294967264 }
  0xfd   :  { %113 = vsyncpa [#allocation3], 1 }
  0xfe   :  { %114 = vsyncpa [#allocation4], 1 }

// kernel: transformer_forward.2
= control target key start
LH: loop header
LB: loop body
LE: loop exit
PB: predicated region body
PF: predicated region fallthrough
CT: control target
= control target key end

     0   :  { %s3450_s0 = inlined_call_operand.hbm [shape: f32[2,8,32], index: 0, kind: input, shape index: {}, may-alias: {0,6}]   ;;  %s3451_s1 = inlined_call_operand.hbm [shape: bf16[2,32,96], index: 1, kind: input, shape index: {}]   ;;  %s3452_s2 = inlined_call_operand.hbm [shape: bf16[2,32,32], index: 2, kind: input, shape index: {}]   ;;  %s3453_s3 = inlined_call_operand.hbm [shape: bf16[2,32,64], index: 3, kind: input, shape index: {}]   ;;  %s3454_s4 = inlined_call_operand.hbm [shape: bf16[2,64,32], index: 4, kind: input, shape index: {}]   ;;  %s3455_s5 = inlined_call_operand.hbm [shape: f32[2,1,352], index: 5, kind: input, shape index: {}]   ;;  %s3456_s6 = inlined_call_operand.hbm [shape: f32[2,8,32], index: 6, kind: output, shape index: {}, may-alias: {0,6}]  }
   0x1   :  { %3484 = sst [smem:[#allocation33_spill]] %s3451_s1 }
   0x2   :  { %3485 = sst [smem:[#allocation34_spill]] %s3453_s3 }
   0x3   :  { %3486 = sst [smem:[#allocation35_spill]] %s3455_s5 }
   0x4   :  { %3487 = sst [smem:[#allocation36_spill]] %s3456_s6 }
   0x5   :  { %11 = vsyncpa [#allocation3], 0 }
   0x6   :  { %13 = vsyncpa [#allocation3 + $0x1], 0 }
   0x7   :  { %14 = vsyncpa [#allocation6], 0 }
   0x8   :  { %16 = vsyncpa [#allocation6 + $0x1], 0 }
   0x9   :  { %17 = vsyncpa [#allocation9], 0 }
   0xa   :  { %19 = vsyncpa [#allocation9 + $0x1], 0 }
   0xb   :  { %20 = vsyncpa [#allocation12], 0 }
   0xc   :  { %22 = vsyncpa [#allocation12 + $0x1], 0 }
   0xd   :  { %23 = vsyncpa [#allocation4], 0 }
   0xe   :  { %25 = vsyncpa [#allocation4 + $0x1], 0  ;;  %s2776_s21 = smov 0   ;;  %s2778_s22 = smov 0  }
   0xf   :  { %s2780_s23 = smov 0   ;;  %s2782_s24 = smov 0  }
  0x10   :  { %s2784_s25 = smov 0   ;;  %s2786_s26 = smov 0  }
  0x11   :  { %s2788_s27 = smov 0   ;;  %s2790_s28 = smov 0  }
  0x12   :  { %s2792_s29 = smov 0   ;;  %s2794_s30 = smov 0  }
  0x13   :  { %s2796_s7 = smov 0  }
  0x14 LB: > { %3488 = sst [smem:[#allocation19_spill]] %s2681_s22  ;;  %p3460_p0 = scmp.eq.s32.totalorder %s2717_s7, 0  ;;  %s2717_s7 = sphi %s2796_s7, %s31_s7   ;;  %s2713_s30 = sphi %s2794_s30, %s3543_s30   ;;  %s2709_s29 = sphi %s2792_s29, %s3549_s29   ;;  %s2705_s28 = sphi %s2790_s28, %s3541_s28   ;;  %s2701_s27 = sphi %s2788_s27, %s3548_s27   ;;  %s2697_s26 = sphi %s2786_s26, %s3540_s26   ;;  %s2693_s25 = sphi %s2784_s25, %s3547_s25   ;;  %s2689_s24 = sphi %s2782_s24, %s3546_s24   ;;  %s2685_s23 = sphi %s2780_s23, %s3545_s23   ;;  %s2681_s22 = sphi %s2778_s22, %s3544_s22   ;;  %s2677_s21 = sphi %s2776_s21, %s3537_s21  }
  0x15   : > { %3489 = sst [smem:[#allocation20_spill]] %s2697_s26  ;;  %p83_p1 = scmp.ne.s32.totalorder %s2685_s23, %s2681_s22 }
  0x16   : > { %3490 = sst [smem:[#allocation21_spill]] %s2701_s27  ;;  %p3459_p2 = scmp.lt.s32.totalorder %s2717_s7, 4 }
  0x17   : > { %3491 = sst [smem:[#allocation22_spill]] %s2705_s28  ;;  %s3458_s9 = sand.u32 1, %s2717_s7  }
  0x18   : > { %3492 = sst [smem:[#allocation23_spill]] %s2713_s30  ;;  %p85_p3 = por %p83_p1, %p3460_p0 }
  0x19   : > { %s2840_s10 = sand.u32 1, %s2685_s23   ;;  %s2843_s11 = sshll.u32 %s2709_s29, 8 }
  0x1a   : > { %s2846_s12 = sshll.u32 %s2840_s10, 4  ;;  %s3493_s1 = sld [smem:[#allocation33_spill]] }
  0x1b   : > { %p2856_p4 = pnand %p3459_p2, %p85_p3  ;;  %s265_s17 = scalar_lea.vmem [#allocation5], %s2846_s12 }
  0x1c   : > { %s272_s18 = sshll.u32 %s265_s17, 4  ;;  %s2866_s19 = scalar_lea.sflag [#allocation6], %s3458_s9  ;;  %s2861_s18 = int_to_ptr.vmem [resolvable:$true] %s272_s18 }
  0x1d   : > { %s3494_s16 = scalar_select %p2856_p4, 1, 0 }
  0x1e   : > { %p2872_p7 = pneg %p2856_p4 }
  0x20   : > { %s2852_s15 = scalar_lea.hbm %s3493_s1, %s2843_s11  ;;  %s2408_s17 = scalar_lea.hbm %s3493_s1, 512 }
  0x21   : > { %s2403_s20 = scalar_lea.hbm %s2852_s15, 256  ;;  %p2409_p10 = scmp.lt.u32.totalorder %s2852_s15, %s3493_s1 }
  0x22   : > { %p2404_p6 = scmp.ne.s32.totalorder %s2852_s15, %s2403_s20  ;;  %p2410_p11 = scmp.lt.u32.totalorder %s2408_s17, %s2403_s20 }
  0x23   : > { %p2412_p13 = scmp.lt.u32.totalorder %s2403_s20, %s2852_s15 }
  0x24   : > { %p2406_p8 = pnand %p2872_p7, %p2404_p6  ;;  %p2411_p12 = por %p2410_p11, %p2409_p10 }
  0x26   : > { %p2407_p9 = pneg %p2406_p8  ;;  %p2413_p1 = por %p2412_p13, %p2411_p12 }
  0x28   : > { %p2414_p3 = pnand %p2413_p1, %p2407_p9 }
  0x2a   : > { %2417 = shalt.err (!%p2414_p3)
}
  0x2b   : > { %s2418_s9 = scalar_lea.vmem %s2861_s18, 256  ;;  %s2719_s8 = smov [#allocation5]  }
  0x2c   : > { %p2419_p6 = scmp.ne.s32.totalorder %s2861_s18, %s2418_s9  ;;  %s2423_s14 = sshll.u32 %s2719_s8, 4  ;;  %s2424_s14 = int_to_ptr.vmem [resolvable:$false] %s2423_s14 }
  0x2d   : > { %s2425_s6 = scalar_lea.vmem %s2424_s14, 512  ;;  %p2426_p0 = scmp.lt.s32.totalorder %s2861_s18, %s2424_s14 }
  0x2e   : > { %p2421_p8 = pnand %p2419_p6, %p2872_p7  ;;  %p2427_p5 = scmp.lt.s32.totalorder %s2425_s6, %s2418_s9 }
  0x30   : > { %p2422_p2 = pneg %p2421_p8  ;;  %p2428_p10 = por %p2427_p5, %p2426_p0 }
  0x32   : > { %p2429_p11 = pnand %p2428_p10, %p2422_p2 }
  0x34   : > { %2432 = shalt.err (!%p2429_p11)
}
  0x35   : > { %s3461_s28 = smov 64   ;;  %s3463_s20 = smov 4  }
  0x36   : > { %2251 = dma.hbm_to_vmem [thread:$0]  (!%p2856_p4), %s2852_s15, 256, %s2861_s18, %s2866_s19, %s3461_s28, %s3461_s28, %s3463_s20  }
  0x37   : > { %p362_p0 = scmp.lt.s32.totalorder %s2717_s7, 5  ;;  %s3496_s3 = sld [smem:[#allocation34_spill]] }
  0x38   : > { %p3497_p2 = scmp.ge.s32.totalorder %s2717_s7, 1  ;;  %s307_s6 = scalar_lea.vmem [#allocation8], %s2846_s12 }
  0x39   : > { %s314_s1 = sshll.u32 %s307_s6, 4  ;;  %s3500_s15 = sand.u32 1, %s2717_s7   ;;  %s2913_s1 = int_to_ptr.vmem [resolvable:$true] %s314_s1 }
  0x3a   : > { %p2908_p5 = pnand %p3497_p2, %p362_p0  ;;  %s2917_s18 = scalar_lea.sflag [#allocation9], %s3500_s15 }
  0x3b   : > { %3501 = sst [smem:[#allocation25_spill]] %s2917_s18 }
  0x3c   : > { %s3498_s14 = scalar_select %p2908_p5, 1, 0 }
  0x3d   : > { %s2904_s8 = scalar_lea.hbm %s3496_s3, %s2843_s11  ;;  %s2438_s20 = scalar_lea.hbm %s3496_s3, 512 }
  0x3e   : > { %3499 = sst [smem:[#allocation24_spill]] %s3498_s14  ;;  %s2433_s28 = scalar_lea.hbm %s2904_s8, 256 }
  0x3f   : > { %p2434_p9 = scmp.ne.s32.totalorder %s2904_s8, %s2433_s28  ;;  %p2439_p1 = scmp.lt.u32.totalorder %s2904_s8, %s3496_s3 }
  0x40   : > { %p2440_p3 = scmp.lt.u32.totalorder %s2438_s20, %s2433_s28  ;;  %p2442_p8 = scmp.lt.u32.totalorder %s2433_s28, %s2904_s8 }
  0x41   : > { %p2436_p12 = pnand %p2434_p9, %p2872_p7 }
  0x42   : > { %p2441_p6 = por %p2440_p3, %p2439_p1 }
  0x43   : > { %p2437_p13 = pneg %p2436_p12 }
  0x44   : > { %p2443_p10 = por %p2442_p8, %p2441_p6 }
  0x46   : > { %p2444_p11 = pnand %p2443_p10, %p2437_p13 }
  0x48   : > { %2447 = shalt.err (!%p2444_p11)
}
  0x49   : > { %s2448_s6 = scalar_lea.vmem %s2913_s1, 256  ;;  %s2722_s15 = smov [#allocation8]  }
  0x4a   : > { %p2449_p0 = scmp.ne.s32.totalorder %s2913_s1, %s2448_s6  ;;  %s2453_s9 = sshll.u32 %s2722_s15, 4  ;;  %s2454_s9 = int_to_ptr.vmem [resolvable:$false] %s2453_s9 }
  0x4b   : > { %s2455_s5 = scalar_lea.vmem %s2454_s9, 512  ;;  %p2456_p12 = scmp.lt.s32.totalorder %s2913_s1, %s2454_s9 }
  0x4c   : > { %p2451_p2 = pnand %p2449_p0, %p2872_p7  ;;  %p2457_p5 = scmp.lt.s32.totalorder %s2455_s5, %s2448_s6 }
  0x4e   : > { %p2452_p9 = pneg %p2451_p2  ;;  %p2458_p1 = por %p2457_p5, %p2456_p12 }
  0x50   : > { %p2459_p3 = pnand %p2458_p1, %p2452_p9 }
  0x52   : > { %2462 = shalt.err (!%p2459_p3)
}
  0x53   : > { %s3502_s27 = smov 4   ;;  %s3503_s28 = smov 64  }
  0x54   : > { %2257 = dma.hbm_to_vmem [thread:$0]  (!%p2856_p4), %s2904_s8, 256, %s2913_s1, %s2917_s18, %s3503_s28, %s3503_s28, %s3502_s27  }
  0x55   : > { %s2945_s20 = sadd.s32 4294967295, %s2717_s7   ;;  %s2047_s17 = sadd.s32 4294967294, %s2717_s7  }
  0x56   : > { %3504 = sst [smem:[#allocation26_spill]] %s2945_s20  ;;  %s40_s6 = sadd.s32 1, %s2709_s29 }
  0x57   : > { %p41_p5 = scmp.ge.s32.totalorder %s40_s6, 2  ;;  %s43_s15 = sadd.s32 1, %s2713_s30 }
  0x58   : > { %s50_s9 = sadd.s32 1, %s2697_s26  ;;  %p57_p13 = scmp.ne.s32.totalorder %s2697_s26, %s2693_s25 }
  0x59   : > { %s3551_s6 = smov (%p41_p5, %s40_s6), 0  ;;  %s3553_s15 = smov (!%p41_p5, %s43_s15), %s2713_s30 }
  0x5a   : > { %3505 = sst [smem:[#allocation27_spill]] %s3551_s6  ;;  %p3506_p6 = scmp.eq.s32.totalorder %s2717_s7, 0 }
  0x5b   : > { %p63_p10 = scmp.ne.s32.totalorder %s2693_s25, %s2689_s24  ;;  %p45_p11 = scmp.ge.s32.totalorder %s3553_s15, 2 }
  0x5c   : > { %p2961_p8 = por %p3506_p6, %p57_p13  ;;  %p64_p0 = scmp.eq.s32.totalorder %s2945_s20, 0 }
  0x5d   : > { %s73_s8 = ssub.s32 %s2709_s29, %s3551_s6  ;;  %p89_p2 = scmp.ne.s32.totalorder %s2681_s22, %s2677_s21 }
  0x5e   : > { %s3555_s15 = smov (%p45_p11, %s3553_s15), 0  ;;  %p2977_p9 = por %p64_p0, %p63_p10 }
  0x5f   : > { %3508 = sst [smem:[#allocation28_spill]] %s3555_s15  ;;  %p74_p12 = scmp.eq.s32.totalorder %s73_s8, 0 }
  0x60   : > { %s3509_s5 = scalar_select %p2977_p9, 1, 0 }
  0x61   : > { %s47_s3 = ssub.s32 %s2713_s30, %s3555_s15  ;;  %p2983_p1 = por %p89_p2, %p64_p0 }
  0x62   : > { %3510 = sst [smem:[#allocation29_spill]] %s3509_s5  ;;  %p48_p3 = scmp.eq.s32.totalorder %s47_s3, 0 }
  0x63   : > { %s3511_s14 = scalar_select %p2983_p1, 1, 0 }
  0x64   : > { %p217_p5 = scmp.eq.s32.totalorder %s2945_s20, 3  ;;  %s3513_s6 = sadd.s32 1, %s2685_s23 }
  0x65   : > { %3512 = sst [smem:[#allocation30_spill]] %s3511_s14  ;;  %p223_p11 = scmp.eq.s32.totalorder %s2047_s17, 3 }
  0x66   : > { %s2991_s21 = scalar_select %p74_p12, %s2685_s23, %s3513_s6  }
  0x67   : > { %s2994_s22 = scalar_select %p48_p3, %s2697_s26, %s50_s9  }
  0x68   : > { %3514 = sst [smem:[#allocation31_spill]] %s2991_s21  ;;  %p2999_p6 = por %p217_p5, %p57_p13 }
  0x69   : > { %3515 = sst [smem:[#allocation32_spill]] %s2994_s22  ;;  %s243_s5 = sand.u32 1, %s2697_s26  }
  0x6a   : > { %s3516_s18 = scalar_select %p2999_p6, 1, 0 }
  0x6b   : > { %s2051_s8 = sshll.u32 %s2713_s30, 7  ;;  %p3008_p0 = por %p223_p11, %p63_p10 }
  0x6c   : > { %s2050_s3 = sshll.u32 %s243_s5, 3  ;;  %s3015_s6 = scalar_lea.hbm %s3450_s0, %s2051_s8 }
  0x6d   : > { %s3517_s15 = scalar_select %p3008_p0, 1, 0 }
  0x6e   : > { %p3518_p2 = scmp.lt.s32.totalorder %s2717_s7, 4  ;;  %s247_s9 = scalar_lea.vmem [#allocation2], %s2050_s3 }
  0x6f   : > { %s254_s30 = sshll.u32 %s247_s9, 4  ;;  %s244_s22 = scalar_lea.sflag [#allocation3], %s243_s5  ;;  %s3025_s30 = int_to_ptr.vmem [resolvable:$true] %s254_s30 }
  0x70   : > { %p3021_p13 = pnand %p3518_p2, %p2961_p8  ;;  %s2463_s14 = scalar_lea.hbm %s3015_s6, 128 }
  0x71   : > { %p2464_p10 = scmp.ne.s32.totalorder %s3015_s6, %s2463_s14  ;;  %s2468_s8 = scalar_lea.hbm %s3450_s0, 256 }
  0x72   : > { %p2465_p12 = pneg %p3021_p13  ;;  %p2469_p8 = scmp.lt.u32.totalorder %s3015_s6, %s3450_s0 }
  0x73   : > { %p2470_p11 = scmp.lt.u32.totalorder %s2468_s8, %s2463_s14  ;;  %p2472_p0 = scmp.lt.u32.totalorder %s2463_s14, %s3015_s6 }
  0x74   : > { %p2466_p3 = pnand %p2465_p12, %p2464_p10 }
  0x75   : > { %p2471_p2 = por %p2470_p11, %p2469_p8 }
  0x76   : > { %p2467_p5 = pneg %p2466_p3 }
  0x77   : > { %p2473_p6 = por %p2472_p0, %p2471_p2 }
  0x79   : > { %p2474_p1 = pnand %p2473_p6, %p2467_p5 }
  0x7b   : > { %2477 = shalt.err (!%p2474_p1)
}
  0x7c   : > { %s2478_s5 = scalar_lea.vmem %s3025_s30, 128  ;;  %s2723_s3 = smov [#allocation2]  }
  0x7d   : > { %p2479_p10 = scmp.ne.s32.totalorder %s3025_s30, %s2478_s5  ;;  %s2483_s9 = sshll.u32 %s2723_s3, 4  ;;  %s2484_s9 = int_to_ptr.vmem [resolvable:$false] %s2483_s9 }
  0x7e   : > { %s2485_s26 = scalar_lea.vmem %s2484_s9, 256  ;;  %p2486_p4 = scmp.lt.s32.totalorder %s3025_s30, %s2484_s9 }
  0x7f   : > { %p2481_p3 = pnand %p2479_p10, %p2465_p12  ;;  %p2487_p8 = scmp.lt.s32.totalorder %s2485_s26, %s2478_s5 }
  0x81   : > { %p2482_p9 = pneg %p2481_p3  ;;  %p2488_p11 = por %p2487_p8, %p2486_p4 }
  0x83   : > { %p2489_p0 = pnand %p2488_p11, %p2482_p9 }
  0x85   : > { %2492 = shalt.err (!%p2489_p0)
}
  0x86   : > { %2248 = dma.hbm_to_vmem [thread:$0]  (!%p3021_p13), %s3015_s6, 128, %s3025_s30, %s244_s22  }
  0x87   : > { %s3056_s20 = scalar_lea.hbm %s3452_s2, %s2843_s11  ;;  %s286_s1 = scalar_lea.vmem [#allocation7], %s2846_s12 }
  0x88   : > { %s293_s8 = sshll.u32 %s286_s1, 4  ;;  %s2061_s17 = sshll.u32 %s2840_s10, 5  ;;  %s3059_s8 = int_to_ptr.vmem [resolvable:$true] %s293_s8 }
  0x89   : > { %s2493_s5 = scalar_lea.hbm %s3056_s20, 256  ;;  %s2498_s6 = scalar_lea.hbm %s3452_s2, 512 }
  0x8a   : > { %p2494_p4 = scmp.ne.s32.totalorder %s3056_s20, %s2493_s5  ;;  %p2499_p6 = scmp.lt.u32.totalorder %s3056_s20, %s3452_s2 }
  0x8b   : > { %p2500_p13 = scmp.lt.u32.totalorder %s2498_s6, %s2493_s5  ;;  %p2502_p5 = scmp.lt.u32.totalorder %s2493_s5, %s3056_s20 }
  0x8c   : > { %p2496_p9 = pnand %p2494_p4, %p2872_p7 }
  0x8d   : > { %p2501_p12 = por %p2500_p13, %p2499_p6 }
  0x8e   : > { %p2497_p1 = pneg %p2496_p9 }
  0x8f   : > { %p2503_p2 = por %p2502_p5, %p2501_p12 }
  0x91   : > { %p2504_p10 = pnand %p2503_p2, %p2497_p1 }
  0x93   : > { %2507 = shalt.err (!%p2504_p10)
}
  0x94   : > { %s2508_s12 = scalar_lea.vmem %s3059_s8, 256  ;;  %s2724_s9 = smov [#allocation7]  }
  0x95   : > { %p2509_p3 = scmp.ne.s32.totalorder %s3059_s8, %s2508_s12  ;;  %s2513_s26 = sshll.u32 %s2724_s9, 4  ;;  %s2514_s26 = int_to_ptr.vmem [resolvable:$false] %s2513_s26 }
  0x96   : > { %s2515_s21 = scalar_lea.vmem %s2514_s26, 512  ;;  %p2516_p0 = scmp.lt.s32.totalorder %s3059_s8, %s2514_s26 }
  0x97   : > { %p2511_p8 = pnand %p2509_p3, %p2872_p7  ;;  %p2517_p4 = scmp.lt.s32.totalorder %s2515_s21, %s2508_s12 }
  0x99   : > { %p2512_p11 = pneg %p2511_p8  ;;  %p2518_p9 = por %p2517_p4, %p2516_p0 }
  0x9b   : > { %p2519_p6 = pnand %p2518_p9, %p2512_p11 }
  0x9d   : > { %2522 = shalt.err (!%p2519_p6)
}
  0x9e   : > { %p3520_p1 = scmp.ne.s32.totalorder %s3494_s16, 0  ;;  %s2113_s14 = sshll.u32 %s2709_s29, 9 }
  0x9f   : > { %s3091_s22 = scalar_lea.hbm %s3454_s4, %s2113_s14  ;;  %s328_s30 = scalar_lea.vmem [#allocation10], %s2061_s17 }
  0xa0   : > { %2254 = dma.hbm_to_vmem [thread:$0]  (!%p3520_p1), %s3056_s20, 256, %s3059_s8, %s2866_s19, %s3503_s28, %s3503_s28, %s3502_s27  }
  0xa1   : > { %s335_s6 = sshll.u32 %s328_s30, 4  ;;  %s2523_s11 = scalar_lea.hbm %s3091_s22, 512  ;;  %s3095_s6 = int_to_ptr.vmem [resolvable:$true] %s335_s6 }
  0xa2   : > { %p2524_p13 = scmp.ne.s32.totalorder %s3091_s22, %s2523_s11  ;;  %s2528_s8 = scalar_lea.hbm %s3454_s4, 1024 }
  0xa3   : > { %p2529_p2 = scmp.lt.u32.totalorder %s3091_s22, %s3454_s4  ;;  %p2530_p10 = scmp.lt.u32.totalorder %s2528_s8, %s2523_s11 }
  0xa4   : > { %p2526_p12 = pnand %p2524_p13, %p2872_p7  ;;  %p2532_p8 = scmp.lt.u32.totalorder %s2523_s11, %s3091_s22 }
  0xa5   : > { %p2531_p3 = por %p2530_p10, %p2529_p2 }
  0xa6   : > { %p2527_p5 = pneg %p2526_p12 }
  0xa7   : > { %p2533_p11 = por %p2532_p8, %p2531_p3 }
  0xa9   : > { %p2534_p0 = pnand %p2533_p11, %p2527_p5 }
  0xab   : > { %2537 = shalt.err (!%p2534_p0)
}
  0xac   : > { %s2538_s17 = scalar_lea.vmem %s3095_s6, 512  ;;  %s2725_s9 = smov [#allocation10]  }
  0xad   : > { %p2539_p4 = scmp.ne.s32.totalorder %s3095_s6, %s2538_s17  ;;  %s2543_s26 = sshll.u32 %s2725_s9, 4  ;;  %s2544_s26 = int_to_ptr.vmem [resolvable:$false] %s2543_s26 }
  0xae   : > { %s2545_s21 = scalar_lea.vmem %s2544_s26, 1024  ;;  %p2546_p13 = scmp.lt.s32.totalorder %s3095_s6, %s2544_s26 }
  0xaf   : > { %p2541_p9 = pnand %p2539_p4, %p2872_p7  ;;  %p2547_p12 = scmp.lt.s32.totalorder %s2545_s21, %s2538_s17 }
  0xb1   : > { %p2542_p6 = pneg %p2541_p9  ;;  %p2548_p2 = por %p2547_p12, %p2546_p13 }
  0xb3   : > { %p2549_p10 = pnand %p2548_p2, %p2542_p6 }
  0xb5   : > { %2552 = shalt.err (!%p2549_p10)
}
  0xb6   : > { %s3521_s14 = sld [smem:[#allocation25_spill]]  ;;  %s2228_s1 = smul.u32 3, %s2840_s10 }
  0xb7   : > { %s2229_s5 = smul.u32 48, %s2709_s29  ;;  %s3522_s19 = sld [smem:[#allocation35_spill]] }
  0xb8   : > { %s349_s8 = scalar_lea.vmem [#allocation11], %s2228_s1  ;;  %s346_s12 = scalar_lea.sflag [#allocation12], %s2840_s10 }
  0xb9   : > { %s357_s3 = sshll.u32 %s349_s8, 4  ;;  %s358_s3 = int_to_ptr.vmem [resolvable:$true] %s357_s3 }
  0xbc   : > { %2260 = dma.hbm_to_vmem [thread:$0]  (!%p3520_p1), %s3091_s22, 512, %s3095_s6, %s3521_s14, %s3503_s28, %s3503_s28, %s3502_s27  }
  0xbd   : > { %s3127_s20 = scalar_lea.hbm %s3522_s19, %s2229_s5  ;;  %s2558_s22 = scalar_lea.hbm %s3522_s19, 96 }
  0xbe   : > { %s2553_s17 = scalar_lea.hbm %s3127_s20, 48  ;;  %p2559_p11 = scmp.lt.u32.totalorder %s3127_s20, %s3522_s19 }
  0xbf   : > { %p2554_p5 = scmp.ne.s32.totalorder %s3127_s20, %s2553_s17  ;;  %p2560_p0 = scmp.lt.u32.totalorder %s2558_s22, %s2553_s17 }
  0xc0   : > { %p2562_p9 = scmp.lt.u32.totalorder %s2553_s17, %s3127_s20 }
  0xc1   : > { %p2556_p3 = pnand %p2554_p5, %p2872_p7  ;;  %p2561_p4 = por %p2560_p0, %p2559_p11 }
  0xc3   : > { %p2557_p8 = pneg %p2556_p3  ;;  %p2563_p6 = por %p2562_p9, %p2561_p4 }
  0xc5   : > { %p2564_p13 = pnand %p2563_p6, %p2557_p8 }
  0xc7   : > { %2567 = shalt.err (!%p2564_p13)
}
  0xc8   : > { %s2568_s10 = scalar_lea.vmem %s358_s3, 48  ;;  %s2726_s26 = smov [#allocation11]  }
  0xc9   : > { %p2569_p12 = scmp.ne.s32.totalorder %s358_s3, %s2568_s10  ;;  %s2573_s21 = sshll.u32 %s2726_s26, 4  ;;  %s2574_s21 = int_to_ptr.vmem [resolvable:$false] %s2573_s21 }
  0xca   : > { %s2575_s14 = scalar_lea.vmem %s2574_s21, 96  ;;  %p2576_p5 = scmp.lt.s32.totalorder %s358_s3, %s2574_s21 }
  0xcb   : > { %p2571_p2 = pnand %p2569_p12, %p2872_p7  ;;  %p2577_p3 = scmp.lt.s32.totalorder %s2575_s14, %s2568_s10 }
  0xcd   : > { %p2572_p10 = pneg %p2571_p2  ;;  %p2578_p1 = por %p2577_p3, %p2576_p5 }
  0xcf   : > { %p2579_p0 = pnand %p2578_p1, %p2572_p10 }
  0xd1   : > { %2582 = shalt.err (!%p2579_p0)
}
  0xd2   : > { %p3523_p11 = scmp.ne.s32.totalorder %s3494_s16, 0  ;;  %s3524_s1 = sld [smem:[#allocation24_spill]] }
  0xd4   : > { %2263 = dma.hbm_to_vmem [thread:$0]  (!%p3523_p11), %s3127_s20, 48, %s358_s3, %s346_s12  }
  0xd8   : > { %p3525_p8 = scmp.ne.s32.totalorder %s3524_s1, 0 }
  0xd9   : > { %s3526_s13 = sld [smem:[#allocation29_spill]] (!%p3525_p8)  ;;  %s3150_s5 = sand.u32 (!%p3525_p8), 1, %s2693_s25  }
  0xda   : > { %366 = sbr.rel (%p3525_p8) target bundleno = 2817 (0xb01), region = 44  ;;  %s2066_s30 = sshll.u32 (!%p3525_p8), %s3150_s5, 3 }
  0xdb   : > { %s369_s11 = scalar_lea.sflag (!%p3525_p8), [#allocation3], %s3150_s5  ;;  %s372_s8 = scalar_lea.vmem (!%p3525_p8), [#allocation2], %s2066_s30 }
  0xdf   : > { %p3527_p7 = scmp.ne.s32.totalorder (!%p3525_p8), %s3526_s13, 0 }
  0xe1   : > { %2656 = dma.done.wait (%p3527_p7), %s369_s11, 128  }
  0xe2   : > { %2658 = vsyncadd (%p3527_p7), %s369_s11, 4294967168  ;;  %s3528_s16 = sld [smem:[#allocation26_spill]]  ;;  %s3529_s17 = sld [smem:[#allocation19_spill]] }
  0xe3   : > { %s3530_s20 = sld [smem:[#allocation30_spill]] }
  0xe8   : > { %s377_s3 = sand.u32 1, %s3528_s16   ;;  %s379_s12 = sand.u32 1, %s3529_s17  }
  0xe9   : > { %s3160_s27 = sshll.u32 %s379_s12, 4  ;;  %s378_s28 = scalar_lea.sflag [#allocation6], %s377_s3 }
  0xea   : > { %s381_s22 = scalar_lea.vmem [#allocation5], %s3160_s27  ;;  %p3531_p1 = scmp.ne.s32.totalorder %s3530_s20, 0 }
  0xec   : > { %2660 = dma.done.wait (%p3531_p1), %s378_s28, 512  }
  0xed   : > { %2662 = vsyncadd (%p3531_p1), %s378_s28, 4294966784  ;;  %s390_s6 = scalar_lea.vmem [#allocation7], %s3160_s27  ;;  %s396_s9 = scalar_lea.sflag [#allocation9], %s377_s3 }
  0xee   : > { %s399_s10 = scalar_lea.vmem [#allocation8], %s3160_s27 }
  0xef   : > { %2664 = dma.done.wait (%p3531_p1), %s396_s9, 768  }
  0xf0   : > { %2666 = vsyncadd (%p3531_p1), %s396_s9, 4294966528  ;;  %s2070_s26 = sshll.u32 %s379_s12, 5  ;;  %s2230_s21 = smul.u32 3, %s379_s12 }
  0xf1   : > { %s3173_s14 = scalar_lea.vmem [#allocation10], %s2070_s26  ;;  %s414_s1 = scalar_lea.sflag [#allocation12], %s379_s12 }
  0xf2   : > { %s3175_s13 = scalar_lea.vmem [#allocation11], %s2230_s21 }
  0xf3   : > { %2668 = dma.done.wait (%p3531_p1), %s414_s1, 48  }
  0xf4   : > { %2670 = vsyncadd (%p3531_p1), %s414_s1, 4294967248  ;;  %s3181_s11 = scalar_lea.vmem [#allocation13], %s2066_s30  ;;  %s3532_s16 = sld [smem:[#allocation21_spill]] }
  0xfa   : > { %p2072_p4 = scmp.ne.s32.totalorder %s3532_s16, 0 }
  0xfb   : > { %v476_v0 = vld [vmem:[%s372_s8] sm:$0xff] (!%p2072_p4)  ;;  %vm477_vm0 = vcmask (!%p2072_p4), 261120  }
  0xfc   : > { %475 = sbr.rel (%p2072_p4) target bundleno = 259 (0x103), region = 72  ;;  %478 = vst.msk [vmem:[%s3181_s11] sm:$0xff] (!%p2072_p4), %vm477_vm0, %v476_v0 }
 0x103 PF: > { %v2373_v1 = vld [vmem:[%s381_s22] sm:$0xff]   ;;  %v2727_v2 = vmov 0.0   ;;  %v2374_v3 = vld [vmem:[%s381_s22 + $0x8] sm:$0xff]   ;;  %vm2728_vm1 = vmmov 0   ;;  %vm506_vm2 = vcmask 261120   ;;  %s2729_s30 = smov 104   ;;  %v566_v18 = vlaneseq }
 0x104   : > { %2144 = vmatprep.subr.bf16.mxu0 %v2727_v2  ;;  %2152 = vmatprep.subr.bf16.mxu1 %v2727_v2  ;;  %v3190_v4 = vld [vmem:[%s3181_s11] sm:$0xff]  ;;  %v3202_v6 = vld [vmem:[%s3175_s13] ss:$0 sm:$0xff]  ;;  %s2730_s8 = smov 120   ;;  %s2731_s17 = smov 96   ;;  %vm1012_vm3 = vcmask 64512  }
 0x105   : > { %2145 = vmatpush3.bf16.msra.mxu0 %v2373_v1  ;;  %2148 = vmatprep.mubr.msk.bf16.mxu0 %vm2728_vm1, %v2727_v2  ;;  %v483_v5 = vpack.c.bf16 %v3190_v4, %v3190_v4  ;;  %s2732_s20 = smov 112   ;;  %s2733_s3 = smov 64   ;;  %v2734_v16 = vmov 1983009808   ;;  %v2735_v19 = vmov 1934713408  }
 0x106   : > { %2146 = vmatprep.subr.bf16.mxu0 %v2727_v2  ;;  %2154 = vmatprep.mubr.msk.bf16.mxu1 %vm2728_vm1, %v2727_v2  ;;  %v564_v17 = vunpack.c.l.s4 %v2734_v16  ;;  %v596_v20 = vunpack.c.l.s4 %v2735_v19  ;;  %v567_v22 = vshrl.u32 %v566_v18, 7  ;;  %vm1240_vm4 = vcmask 1043456   ;;  %s2736_s12 = smov 16   ;;  %s2737_s28 = smov 8  }
 0x107   : > { %s2738_s22 = smov 24   ;;  %vm1579_vm5 = vcmask 130048   ;;  %vm1581_vm6 = vcmask 195584   ;;  %vm1775_vm7 = vcmask 523264   ;;  %s3533_s27 = sld [smem:[#allocation22_spill]] }
 0x108   : > { %v565_v21 = vunpack.c.0.s8 %v564_v17  ;;  %v597_v25 = vunpack.c.0.s8 %v596_v20  ;;  %p3535_p6 = scmp.ne.s32.totalorder %s3516_s18, 0 }
 0x109   : > { %2147 = vmatpush3.bf16.msra.mxu0 %v2374_v3 }
 0x10a   : > { %2158 = vmatprep.subr.bf16.mxu0 %v2727_v2  ;;  %v3217_v26 = vsub.s32 %v565_v21, %v567_v22  ;;  %v3219_v33 = vsub.s32 %v597_v25, %v567_v22 }
 0x10c   : > { %2149 = vmatmul.mubr.msk.bf16.vlgmr.msra.gmra.mrb[0].mxu0 %vm506_vm2, %v483_v5 }
 0x10d   : > { %2160 = vmatprep.mubr.msk.bf16.mxu0 %vm2728_vm1, %v2727_v2  ;;  %s2107_s9 = sshll.u32 %s3533_s27, 7 }
 0x1df   : > { %v544_v7 = vpop.f32.mrb[0].mxu0 }
 0x1e0   : > { %v545_v8 = vadd.f32 %v3202_v6, %v544_v7  ;;  %v2150_v9 = vpop.f32.mrb[1].mxu0 }
 0x1e1   : > { %v547_v10 = vpop.f32.mrb[2].mxu0 }
 0x1e2   : > { %v2151_v11 = vpop.f32.mrb[3].mxu0  ;;  %706 = vrot.lane.b32.xlu1 %v545_v8, %s2729_s30  ;;  %702 = vrot.lane.b32.xlu0 %v545_v8, %s2730_s8  ;;  %v550_v15 = vmul.f32 0.35355338, %v545_v8 }
 0x1e6   : > { %708 = vrot.lane.b32.xlu1 %v545_v8, %s2731_s17  ;;  %704 = vrot.lane.b32.xlu0 %v545_v8, %s2732_s20 }
 0x254   : > { %v703_v12 = vpop.permute.xlu0 %702  ;;  %v3207_v13 = vpop.permute.xlu1 %706 }
 0x255   : > { %710 = vrot.lane.b32.xlu0 %v703_v12, %s2731_s17 }
 0x258   : > { %v3209_v14 = vpop.permute.xlu0 %704  ;;  %v709_v23 = vpop.permute.xlu1 %708 }
 0x259   : > { %714 = vrot.lane.b32.xlu0 %v3207_v13, %s2731_s17  ;;  %712 = vrot.lane.b32.xlu1 %v3209_v14, %s2731_s17 }
 0x25d   : > { %555 = vrot.lane.b32.xlu0 %v550_v15, %s2732_s20  ;;  %552 = vrot.lane.b32.xlu1 %v550_v15, %s2730_s8 }
 0x261   : > { %860 = vrot.lane.b32.xlu0 %v545_v8, %s2733_s3  ;;  %558 = vrot.lane.b32.xlu1 %v550_v15, %s2729_s30  ;;  %s2740_s30 = smov [#allocation13]  }
 0x262   : > { %s2587_s8 = sshll.u32 %s2740_s30, 4  ;;  %s2588_s8 = int_to_ptr.vmem [resolvable:$false] %s2587_s8 }
 0x265   : > { %862 = vrot.lane.b32.xlu1 %v703_v12, %s2733_s3 }
 0x2c7   : > { %v711_v24 = vpop.permute.xlu0 %710 }
 0x2cb   : > { %v713_v27 = vpop.permute.xlu1 %712  ;;  %v715_v28 = vpop.permute.xlu0 %714 }
 0x2cc   : > { %v720_v29 = vcombine.low %v709_v23, %v713_v27  ;;  %v721_v30 = vcombine.high %v709_v23, %v713_v27  ;;  %v736_v31 = vcombine.low %v711_v24, %v715_v28  ;;  %v737_v32 = vcombine.high %v711_v24, %v715_v28 }
 0x2ce   : > { %v728_v34 = vrot.slane %v720_v29, %v3217_v26  ;;  %v735_v35 = vrot.slane %v721_v30, %v3217_v26  ;;  %v744_v36 = vrot.slane %v736_v31, %v3217_v26  ;;  %v751_v37 = vrot.slane %v737_v32, %v3217_v26 }
 0x2cf   : > { %v553_v38 = vpop.permute.xlu1 %552  ;;  %v556_v43 = vpop.permute.xlu0 %555 }
 0x2d0   : > { %v752_v39 = vcombine.low %v728_v34, %v744_v36  ;;  %v753_v40 = vcombine.high %v728_v34, %v744_v36  ;;  %v768_v41 = vcombine.low %v735_v35, %v751_v37  ;;  %v769_v42 = vcombine.high %v735_v35, %v751_v37 }
 0x2d1   : > { %v561_v48 = vcombine.low %v550_v15, %v556_v43  ;;  %v562_v49 = vcombine.high %v550_v15, %v556_v43 }
 0x2d2   : > { %v760_v44 = vrot.slane %v752_v39, %v3219_v33  ;;  %v767_v45 = vrot.slane %v753_v40, %v3219_v33  ;;  %v776_v46 = vrot.slane %v768_v41, %v3219_v33  ;;  %v783_v47 = vrot.slane %v769_v42, %v3219_v33 }
 0x2d3   : > { %v559_v50 = vpop.permute.xlu1 %558  ;;  %v569_v61 = vrot.slane %v561_v48, %v3217_v26  ;;  %v576_v62 = vrot.slane %v562_v49, %v3217_v26 }
 0x2d4   : > { %v788_v51 = vcombine.low %v760_v44, %v767_v45  ;;  %v2079_v52 = vcombine.high %v760_v44, %v767_v45  ;;  %v804_v53 = vcombine.low %v776_v46, %v783_v47  ;;  %v2080_v54 = vcombine.high %v776_v46, %v783_v47 }
 0x2d5   : > { %v577_v55 = vcombine.low %v553_v38, %v559_v50  ;;  %v578_v56 = vcombine.high %v553_v38, %v559_v50 }
 0x2d6   : > { %v795_v57 = vrot.slane %v788_v51, %v3217_v26  ;;  %v803_v58 = vrot.slane %v2079_v52, %v3217_v26  ;;  %v811_v59 = vrot.slane %v804_v53, %v3217_v26  ;;  %v819_v60 = vrot.slane %v2080_v54, %v3217_v26 }
 0x2d7   : > { %v585_v63 = vrot.slane %v577_v55, %v3217_v26  ;;  %v592_v0 = vrot.slane %v578_v56, %v3217_v26 }
 0x2d8   : > { %v820_v1 = vcombine.low %v795_v57, %v803_v58  ;;  %v836_v3 = vcombine.low %v811_v59, %v819_v60  ;;  %v821_v12 = vcombine.high %v795_v57, %v803_v58  ;;  %v837_v15 = vcombine.high %v811_v59, %v819_v60 }
 0x2d9   : > { %v593_v5 = vcombine.low %v569_v61, %v585_v63  ;;  %v594_v7 = vcombine.high %v569_v61, %v585_v63  ;;  %v609_v8 = vcombine.low %v576_v62, %v592_v0  ;;  %v610_v9 = vcombine.high %v576_v62, %v592_v0 }
 0x2da   : > { %v828_v10 = vrot.slane %v820_v1, %v3219_v33  ;;  %v844_v11 = vrot.slane %v836_v3, %v3219_v33  ;;  %v835_v29 = vrot.slane %v821_v12, %v3219_v33  ;;  %v851_v30 = vrot.slane %v837_v15, %v3219_v33 }
 0x2db   : > { %v601_v16 = vrot.slane %v593_v5, %v3219_v33  ;;  %v608_v17 = vrot.slane %v594_v7, %v3219_v33  ;;  %v617_v18 = vrot.slane %v609_v8, %v3219_v33  ;;  %v624_v19 = vrot.slane %v610_v9, %v3219_v33 }
 0x2dc   : > { %v852_v20 = vcombine.low %v828_v10, %v844_v11  ;;  %v853_v21 = vcombine.high %v828_v10, %v844_v11  ;;  %v854_v40 = vcombine.low %v835_v29, %v851_v30  ;;  %v855_v41 = vcombine.high %v835_v29, %v851_v30 }
 0x2dd   : > { %v629_v22 = vcombine.low %v601_v16, %v608_v17  ;;  %v2077_v23 = vcombine.high %v601_v16, %v608_v17  ;;  %v645_v24 = vcombine.low %v617_v18, %v624_v19  ;;  %v2078_v25 = vcombine.high %v617_v18, %v624_v19 }
 0x2de   : > { %v856_v27 = vpack.c.bf16 %v852_v20, %v852_v20  ;;  %v857_v28 = vpack.c.bf16 %v853_v21, %v853_v21  ;;  %v858_v48 = vpack.c.bf16 %v854_v40, %v854_v40  ;;  %v859_v49 = vpack.c.bf16 %v855_v41, %v855_v41  ;;  %v861_v21 = vpop.permute.xlu0 %860 }
 0x2df   : > { %v636_v31 = vrot.slane %v629_v22, %v3217_v26  ;;  %v644_v32 = vrot.slane %v2077_v23, %v3217_v26  ;;  %v652_v34 = vrot.slane %v645_v24, %v3217_v26  ;;  %v660_v35 = vrot.slane %v2078_v25, %v3217_v26  ;;  %v863_v22 = vpop.permute.xlu1 %862 }
 0x2e0   : > { %v1017_v36 = vsel %vm1012_vm3, %v856_v27, 0  ;;  %v1063_v37 = vsel %vm1012_vm3, %v857_v28, 0  ;;  %v1109_v54 = vsel %vm1012_vm3, %v858_v48, 0  ;;  %v1155_v55 = vsel %vm1012_vm3, %v859_v49, 0 }
 0x2e1   : > { %2153 = vmatpush3.bf16.xpose.msra.mxu1 %v1017_v36  ;;  %2159 = vmatpush3.bf16.xpose.msra.mxu0 %v1063_v37  ;;  %v661_v38 = vcombine.low %v636_v31, %v644_v32  ;;  %v677_v39 = vcombine.low %v652_v34, %v660_v35  ;;  %v662_v43 = vcombine.high %v636_v31, %v644_v32 }
 0x2e2   : > { %2164 = vmatprep.subr.bf16.mxu1 %v2727_v2  ;;  %2170 = vmatprep.subr.bf16.mxu0 %v2727_v2  ;;  %v678_v44 = vcombine.high %v652_v34, %v660_v35 }
 0x2e3   : > { %v669_v42 = vrot.slane %v661_v38, %v3219_v33  ;;  %v685_v45 = vrot.slane %v677_v39, %v3219_v33  ;;  %v676_v52 = vrot.slane %v662_v43, %v3219_v33 }
 0x2e4   : > { %v692_v53 = vrot.slane %v678_v44, %v3219_v33 }
 0x2e5   : > { %v693_v46 = vcombine.low %v669_v42, %v685_v45  ;;  %v694_v47 = vcombine.high %v669_v42, %v685_v45 }
 0x2e6   : > { %v695_v56 = vcombine.low %v676_v52, %v692_v53  ;;  %v696_v57 = vcombine.high %v676_v52, %v692_v53 }
 0x2e7   : > { %v697_v50 = vpack.c.bf16 %v693_v46, %v693_v46  ;;  %v698_v51 = vpack.c.bf16 %v694_v47, %v694_v47 }
 0x2e8   : > { %v699_v58 = vpack.c.bf16 %v695_v56, %v695_v56  ;;  %v700_v59 = vpack.c.bf16 %v696_v57, %v696_v57 }
 0x2e9   : > { %2155 = vmatmul.mubr.msk.bf16.vlgmr.msra.gmra.mrb[0].mxu1 %vm1012_vm3, %v697_v50  ;;  %2161 = vmatmul.mubr.msk.bf16.vlgmr.msra.gmra.mrb[4].mxu0 %vm1012_vm3, %v698_v51 }
 0x2ea   : > { %2165 = vmatpush3.bf16.xpose.msra.mxu1 %v1109_v54  ;;  %2171 = vmatpush3.bf16.xpose.msra.mxu0 %v1155_v55 }
 0x2eb   : > { %2166 = vmatprep.mubr.msk.bf16.mxu1 %vm2728_vm1, %v2727_v2  ;;  %2172 = vmatprep.mubr.msk.bf16.mxu0 %vm2728_vm1, %v2727_v2 }
 0x2ec   : > { %2176 = vmatprep.subr.bf16.mxu1 %v2727_v2  ;;  %2182 = vmatprep.subr.bf16.mxu0 %v2727_v2 }
 0x2f1   : > { %2167 = vmatmul.mubr.msk.bf16.vlgmr.msra.gmra.mrb[4].mxu1 %vm1012_vm3, %v699_v58  ;;  %2173 = vmatmul.mubr.msk.bf16.vlgmr.msra.gmra.mrb[8].mxu0 %vm1012_vm3, %v700_v59 }
 0x2f2   : > { %2178 = vmatprep.mubr.msk.bf16.mxu1 %vm2728_vm1, %v2727_v2  ;;  %2184 = vmatprep.mubr.msk.bf16.mxu0 %vm2728_vm1, %v2727_v2 }
 0x3bc   : > { %v1053_v60 = vpop.f32.mrb[0].mxu1  ;;  %v1099_v61 = vpop.f32.mrb[4].mxu0 }
 0x3bd   : > { %v2156_v62 = vpop.f32.mrb[1].mxu1  ;;  %v2162_v63 = vpop.f32.mrb[5].mxu0  ;;  %v1200_v0 = vsel %vm1012_vm3, %v1099_v61, -inf  ;;  %v1197_v1 = vsel %vm1012_vm3, %v1053_v60, -inf }
 0x3be   : > { %1201 = vmax.xlane.f32.xlu1 %v1200_v0  ;;  %v1102_v3 = vpop.f32.mrb[6].mxu0  ;;  %1198 = vmax.xlane.f32.xlu0 %v1197_v1  ;;  %v1056_v5 = vpop.f32.mrb[2].mxu1 }
 0x3bf   : > { %v2157_v7 = vpop.f32.mrb[3].mxu1  ;;  %v2163_v8 = vpop.f32.mrb[7].mxu0 }
 0x3c4   : > { %v3275_v9 = vpop.f32.mrb[4].mxu1  ;;  %v3277_v10 = vpop.f32.mrb[8].mxu0 }
 0x3c5   : > { %v2168_v11 = vpop.f32.mrb[5].mxu1  ;;  %v2174_v12 = vpop.f32.mrb[9].mxu0  ;;  %v1206_v19 = vsel %vm1012_vm3, %v3277_v10, -inf  ;;  %v1203_v20 = vsel %vm1012_vm3, %v3275_v9, -inf }
 0x3c6   : > { %v1148_v15 = vpop.f32.mrb[6].mxu1  ;;  %v1194_v16 = vpop.f32.mrb[10].mxu0 }
 0x3c7   : > { %v2169_v17 = vpop.f32.mrb[7].mxu1  ;;  %v2175_v18 = vpop.f32.mrb[11].mxu0 }
 0x3cf   : > { %866 = vrot.lane.b32.xlu1 %v3207_v13, %s2733_s3 }
 0x3d4   : > { %864 = vrot.lane.b32.xlu0 %v3209_v14, %s2733_s3 }
 0x3f3   : > { %1207 = vmax.xlane.f32.xlu1 %v1206_v19  ;;  %1204 = vmax.xlane.f32.xlu0 %v1203_v20 }
 0x44b   : > { %v1199_v23 = vpop.xlane.xlu0 %1198  ;;  %v1202_v24 = vpop.xlane.xlu1 %1201 }
 0x44c   : > { %v1209_v25 = vsub.f32 %v1053_v60, %v1199_v23  ;;  %v1210_v27 = vsub.f32 %v1099_v61, %v1202_v24 }
 0x44e   : > { %v1213_v28 = vmul.f32 1.442695, %v1209_v25  ;;  %v1215_v29 = vmul.f32 1.442695, %v1210_v27 }
 0x44f   : > { %v865_v13 = vpop.permute.xlu0 %864  ;;  %v867_v30 = vpop.permute.xlu1 %866 }
 0x450   : > { %2383 = vpow2.f32 %v1213_v28  ;;  %v872_v14 = vcombine.low %v861_v21, %v865_v13  ;;  %v873_v31 = vcombine.high %v861_v21, %v865_v13  ;;  %v888_v32 = vcombine.low %v863_v22, %v867_v30 }
 0x451   : > { %v889_v34 = vcombine.high %v863_v22, %v867_v30  ;;  %2385 = vpow2.f32 %v1215_v29 }
 0x452   : > { %v880_v35 = vrot.slane %v872_v14, %v3217_v26  ;;  %v887_v36 = vrot.slane %v873_v31, %v3217_v26  ;;  %v896_v37 = vrot.slane %v888_v32, %v3217_v26 }
 0x453   : > { %v903_v38 = vrot.slane %v889_v34, %v3217_v26 }
 0x454   : > { %v904_v39 = vcombine.low %v880_v35, %v896_v37  ;;  %v905_v40 = vcombine.high %v880_v35, %v896_v37 }
 0x455   : > { %v920_v41 = vcombine.low %v887_v36, %v903_v38  ;;  %v921_v42 = vcombine.high %v887_v36, %v903_v38 }
 0x456   : > { %v912_v43 = vrot.slane %v904_v39, %v3219_v33  ;;  %v919_v44 = vrot.slane %v905_v40, %v3219_v33 }
 0x457   : > { %v928_v45 = vrot.slane %v920_v41, %v3219_v33  ;;  %v935_v46 = vrot.slane %v921_v42, %v3219_v33 }
 0x458   : > { %v940_v47 = vcombine.low %v912_v43, %v919_v44  ;;  %v2081_v48 = vcombine.high %v912_v43, %v919_v44 }
 0x459   : > { %v956_v49 = vcombine.low %v928_v45, %v935_v46  ;;  %v2082_v50 = vcombine.high %v928_v45, %v935_v46 }
 0x45a   : > { %v2384_v51 = vpop.eup %2383  ;;  %v947_v52 = vrot.slane %v940_v47, %v3217_v26  ;;  %v955_v53 = vrot.slane %v2081_v48, %v3217_v26 }
 0x45b   : > { %v963_v54 = vrot.slane %v956_v49, %v3217_v26  ;;  %v971_v55 = vrot.slane %v2082_v50, %v3217_v26  ;;  %v1221_v56 = vsel %vm1012_vm3, %v2384_v51, 0.0  ;;  %v2386_v57 = vpop.eup %2385  ;;  %v1233_v20 = vpack.c.bf16 %v2384_v51, %v2384_v51 }
 0x45c   : > { %1222 = vadd.xlane.f32.xlu0 %v1221_v56  ;;  %v972_v58 = vcombine.low %v947_v52, %v955_v53  ;;  %v973_v59 = vcombine.high %v947_v52, %v955_v53  ;;  %v1224_v0 = vsel %vm1012_vm3, %v2386_v57, 0.0  ;;  %v1234_v21 = vpack.c.bf16 %v2386_v57, %v2386_v57 }
 0x45d   : > { %v988_v60 = vcombine.low %v963_v54, %v971_v55  ;;  %v989_v61 = vcombine.high %v963_v54, %v971_v55 }
 0x45e   : > { %v980_v62 = vrot.slane %v972_v58, %v3219_v33  ;;  %v987_v63 = vrot.slane %v973_v59, %v3219_v33 }
 0x45f   : > { %v996_v1 = vrot.slane %v988_v60, %v3219_v33  ;;  %v1003_v3 = vrot.slane %v989_v61, %v3219_v33 }
 0x460   : > { %1225 = vadd.xlane.f32.xlu0 %v1224_v0 }
 0x461   : > { %v1004_v5 = vcombine.low %v980_v62, %v996_v1  ;;  %v1005_v7 = vcombine.high %v980_v62, %v996_v1  ;;  %v1006_v8 = vcombine.low %v987_v63, %v1003_v3  ;;  %v1007_v11 = vcombine.high %v987_v63, %v1003_v3 }
 0x463   : > { %v1008_v12 = vpack.c.bf16 %v1004_v5, %v1004_v5  ;;  %v1009_v15 = vpack.c.bf16 %v1005_v7, %v1005_v7  ;;  %v1010_v18 = vpack.c.bf16 %v1006_v8, %v1006_v8  ;;  %v1011_v19 = vpack.c.bf16 %v1007_v11, %v1007_v11  ;;  %v2375_v11 = vld [vmem:[%s390_s6] sm:$0xff]  }
 0x465   : > { %v1242_v16 = vsel %vm1240_vm4, %v1008_v12, 0  ;;  %v1288_v17 = vsel %vm1240_vm4, %v1009_v15, 0  ;;  %v1334_v22 = vsel %vm1240_vm4, %v1010_v18, 0  ;;  %v1380_v23 = vsel %vm1240_vm4, %v1011_v19, 0 }
 0x466   : > { %2177 = vmatpush3.bf16.msra.mxu1 %v1242_v16  ;;  %2183 = vmatpush3.bf16.msra.mxu0 %v1288_v17 }
 0x467   : > { %2188 = vmatprep.subr.bf16.mxu1 %v2727_v2  ;;  %2194 = vmatprep.subr.bf16.mxu0 %v2727_v2 }
 0x469   : > { %2179 = vmatmul.mubr.msk.bf16.vlgmr.msra.gmra.mrb[8].mxu1 %vm1012_vm3, %v1233_v20  ;;  %2185 = vmatmul.mubr.msk.bf16.vlgmr.msra.gmra.mrb[12].mxu0 %vm1012_vm3, %v1234_v21 }
 0x46a   : > { %2189 = vmatpush3.bf16.msra.mxu1 %v1334_v22  ;;  %2195 = vmatpush3.bf16.msra.mxu0 %v1380_v23  ;;  %v2376_v22 = vld [vmem:[%s390_s6 + $0x8] sm:$0xff]   ;;  %s2739_s6 = smov 32  }
 0x46b   : > { %2190 = vmatprep.mubr.msk.bf16.mxu1 %vm2728_vm1, %v2727_v2  ;;  %2196 = vmatprep.mubr.msk.bf16.mxu0 %vm2728_vm1, %v2727_v2 }
 0x46c   : > { %2200 = vmatprep.subr.bf16.mxu1 %v2727_v2  ;;  %2208 = vmatprep.subr.bf16.mxu0 %v2727_v2 }
 0x480   : > { %v1205_v24 = vpop.xlane.xlu0 %1204  ;;  %v1208_v25 = vpop.xlane.xlu1 %1207 }
 0x481   : > { %v1211_v27 = vsub.f32 %v3275_v9, %v1205_v24  ;;  %v1212_v28 = vsub.f32 %v3277_v10, %v1208_v25 }
 0x483   : > { %v1217_v29 = vmul.f32 1.442695, %v1211_v27  ;;  %v1219_v13 = vmul.f32 1.442695, %v1212_v28 }
 0x485   : > { %2387 = vpow2.f32 %v1217_v29 }
 0x486   : > { %2389 = vpow2.f32 %v1219_v13 }
 0x48f   : > { %v2388_v30 = vpop.eup %2387 }
 0x490   : > { %v2390_v14 = vpop.eup %2389  ;;  %v1227_v31 = vsel %vm1012_vm3, %v2388_v30, 0.0  ;;  %v1235_v32 = vpack.c.bf16 %v2388_v30, %v2388_v30 }
 0x491   : > { %1228 = vadd.xlane.f32.xlu1 %v1227_v31  ;;  %v1230_v34 = vsel %vm1012_vm3, %v2390_v14, 0.0  ;;  %v1236_v35 = vpack.c.bf16 %v2390_v14, %v2390_v14 }
 0x492   : > { %1231 = vadd.xlane.f32.xlu0 %v1230_v34  ;;  %2191 = vmatmul.mubr.msk.bf16.vlgmr.msra.gmra.mrb[12].mxu1 %vm1012_vm3, %v1235_v32 }
 0x493   : > { %2197 = vmatmul.mubr.msk.bf16.vlgmr.msra.gmra.mrb[16].mxu0 %vm1012_vm3, %v1236_v35  ;;  %2204 = vmatprep.mubr.msk.bf16.mxu1 %vm2728_vm1, %v2727_v2 }
 0x494   : > { %2212 = vmatprep.mubr.msk.bf16.mxu0 %vm2728_vm1, %v2727_v2  ;;  %2201 = vmatpush3.bf16.msra.mxu1 %v2375_v11 }
 0x495   : > { %2202 = vmatprep.subr.bf16.mxu1 %v2727_v2 }
 0x498   : > { %2203 = vmatpush3.bf16.msra.mxu1 %v2376_v22 }
 0x499   : > { %2216 = vmatprep.subr.bf16.mxu1 %v2727_v2 }
 0x4e9   : > { %v1223_v42 = vpop.xlane.xlu0 %1222 }
 0x4ea   : > { %2391 = vrcp.f32 %v1223_v42 }
 0x4ed   : > { %v1226_v43 = vpop.xlane.xlu0 %1225 }
 0x4ee   : > { %2393 = vrcp.f32 %v1226_v43 }
 0x4f4   : > { %v2392_v46 = vpop.eup %2391 }
 0x4f8   : > { %v2394_v47 = vpop.eup %2393 }
 0x51e   : > { %v1229_v44 = vpop.xlane.xlu1 %1228 }
 0x51f   : > { %v1232_v45 = vpop.xlane.xlu0 %1231  ;;  %2395 = vrcp.f32 %v1229_v44 }
 0x520   : > { %2397 = vrcp.f32 %v1232_v45 }
 0x529   : > { %v2396_v48 = vpop.eup %2395 }
 0x52a   : > { %v2398_v50 = vpop.eup %2397 }
 0x53c   : > { %v1278_v9 = vpop.f32.mrb[8].mxu1  ;;  %v1324_v10 = vpop.f32.mrb[12].mxu0 }
 0x53d   : > { %v2180_v36 = vpop.f32.mrb[9].mxu1  ;;  %v2186_v37 = vpop.f32.mrb[13].mxu0  ;;  %v1426_v51 = vmul.f32 %v2392_v46, %v1278_v9  ;;  %v1427_v55 = vmul.f32 %v2394_v47, %v1324_v10 }
 0x53e   : > { %v1281_v38 = vpop.f32.mrb[10].mxu1  ;;  %v1327_v39 = vpop.f32.mrb[14].mxu0 }
 0x53f   : > { %v2181_v40 = vpop.f32.mrb[11].mxu1  ;;  %v2187_v41 = vpop.f32.mrb[15].mxu0 }
 0x565   : > { %v1370_v49 = vpop.f32.mrb[12].mxu1 }
 0x566   : > { %v1428_v52 = vmul.f32 %v2396_v48, %v1370_v49  ;;  %v1416_v53 = vpop.f32.mrb[16].mxu0  ;;  %v2192_v54 = vpop.f32.mrb[13].mxu1 }
 0x567   : > { %v1429_v56 = vmul.f32 %v2398_v50, %v1416_v53  ;;  %v2198_v57 = vpop.f32.mrb[17].mxu0  ;;  %v1373_v58 = vpop.f32.mrb[14].mxu1  ;;  %v2096_v53 = vld [vmem:[%s3175_s13 + $0x1] ss:$0 sm:$0xff] }
 0x568   : > { %v1430_v59 = vcombine.low %v1426_v51, %v1428_v52  ;;  %v1431_v60 = vcombine.high %v1426_v51, %v1428_v52  ;;  %v1419_v61 = vpop.f32.mrb[18].mxu0  ;;  %v2193_v62 = vpop.f32.mrb[15].mxu1 }
 0x569   : > { %v1446_v63 = vcombine.low %v1427_v55, %v1429_v56  ;;  %v1447_v0 = vcombine.high %v1427_v55, %v1429_v56  ;;  %v2199_v1 = vpop.f32.mrb[19].mxu0  ;;  %v2380_v61 = vld [vmem:[%s3173_s14 + $0x8] sm:$0xff]   ;;  %v2381_v62 = vld [vmem:[%s3173_s14 + $0x10] sm:$0xff]  }
 0x56a   : > { %v1438_v3 = vrot.slane %v1430_v59, %v3217_v26  ;;  %v1445_v5 = vrot.slane %v1431_v60, %v3217_v26  ;;  %v2378_v59 = vld [vmem:[%s399_s10 + $0x8] sm:$0xff]   ;;  %v2379_v60 = vld [vmem:[%s3173_s14] sm:$0xff]  }
 0x56b   : > { %v1454_v7 = vrot.slane %v1446_v63, %v3217_v26  ;;  %v1461_v8 = vrot.slane %v1447_v0, %v3217_v26 }
 0x56d   : > { %v1462_v12 = vcombine.low %v1438_v3, %v1454_v7  ;;  %v1463_v15 = vcombine.high %v1438_v3, %v1454_v7  ;;  %v1478_v16 = vcombine.low %v1445_v5, %v1461_v8  ;;  %v1479_v17 = vcombine.high %v1445_v5, %v1461_v8 }
 0x56f   : > { %v1470_v18 = vrot.slane %v1462_v12, %v3219_v33  ;;  %v1477_v19 = vrot.slane %v1463_v15, %v3219_v33  ;;  %v1486_v20 = vrot.slane %v1478_v16, %v3219_v33  ;;  %v1493_v21 = vrot.slane %v1479_v17, %v3219_v33  ;;  %v2382_v15 = vld [vmem:[%s3173_s14 + $0x18] sm:$0xff]   ;;  %s3534_s14 = sld [smem:[#allocation36_spill]] }
 0x571   : > { %v1498_v23 = vcombine.low %v1470_v18, %v1477_v19  ;;  %v2091_v24 = vcombine.high %v1470_v18, %v1477_v19  ;;  %v1514_v25 = vcombine.low %v1486_v20, %v1493_v21  ;;  %v2092_v27 = vcombine.high %v1486_v20, %v1493_v21 }
 0x573   : > { %v1505_v28 = vrot.slane %v1498_v23, %v3217_v26  ;;  %v1513_v29 = vrot.slane %v2091_v24, %v3217_v26  ;;  %v1521_v13 = vrot.slane %v1514_v25, %v3217_v26  ;;  %v1529_v30 = vrot.slane %v2092_v27, %v3217_v26  ;;  %v2100_v23 = vld [vmem:[%s3175_s13 + $0x2] ss:$0 sm:$0xff]  ;;  %s1843_s13 = scalar_lea.sflag [#allocation4], %s3150_s5 }
 0x575   : > { %v1531_v14 = vcombine.high %v1505_v28, %v1513_v29  ;;  %v1547_v31 = vcombine.high %v1521_v13, %v1529_v30  ;;  %v1530_v32 = vcombine.low %v1505_v28, %v1513_v29  ;;  %v1546_v34 = vcombine.low %v1521_v13, %v1529_v30  ;;  %s3385_s1 = scalar_lea.hbm %s3534_s14, %s2107_s9 }
 0x577   : > { %v1545_v35 = vrot.slane %v1531_v14, %v3219_v33  ;;  %v1561_v9 = vrot.slane %v1547_v31, %v3219_v33  ;;  %v1538_v10 = vrot.slane %v1530_v32, %v3219_v33  ;;  %v1554_v36 = vrot.slane %v1546_v34, %v3219_v33 }
 0x579   : > { %v1564_v37 = vcombine.low %v1545_v35, %v1561_v9  ;;  %v1563_v38 = vcombine.high %v1538_v10, %v1554_v36  ;;  %v1565_v39 = vcombine.high %v1545_v35, %v1561_v9  ;;  %v1562_v40 = vcombine.low %v1538_v10, %v1554_v36 }
 0x57b   : > { %1571 = vrot.lane.b32.xlu0 %v1564_v37, %s2736_s12  ;;  %1567 = vrot.lane.b32.xlu1 %v1563_v38, %s2737_s28 }
 0x57f   : > { %1575 = vrot.lane.b32.xlu1 %v1565_v39, %s2738_s22 }
 0x583   : > { %1600 = vrot.lane.b32.xlu1 %v3202_v6, %s2739_s6 }
 0x5ed   : > { %v1568_v26 = vpop.permute.xlu1 %1567  ;;  %v1572_v41 = vpop.permute.xlu0 %1571 }
 0x5ee   : > { %v1578_v42 = vsel %vm1012_vm3, %v1562_v40, %v1568_v26 }
 0x5ef   : > { %v1580_v43 = vsel %vm1579_vm5, %v1578_v42, %v1572_v41 }
 0x5f1   : > { %v1576_v33 = vpop.permute.xlu1 %1575 }
 0x5f2   : > { %v1582_v44 = vsel %vm1581_vm6, %v1580_v43, %v1576_v33 }
 0x5f3   : > { %v1583_v45 = vpack.c.bf16 %v1582_v44, %v1582_v44 }
 0x5f5   : > { %2205 = vmatmul.mubr.msk.bf16.vlgmr.msra.gmra.mrb[16].mxu1 %vm506_vm2, %v1583_v45  ;;  %v1601_v46 = vpop.permute.xlu1 %1600 }
 0x5f6   : > { %2224 = vmatprep.mubr.msk.bf16.mxu1 %vm2728_vm1, %v2727_v2  ;;  %2217 = vmatpush3.bf16.msra.mxu1 %v2379_v60 }
 0x5f7   : > { %2218 = vmatprep.subr.bf16.mxu1 %v2727_v2 }
 0x5fa   : > { %2219 = vmatpush3.bf16.msra.mxu1 %v2380_v61 }
 0x5fb   : > { %2220 = vmatprep.subr.bf16.mxu1 %v2727_v2 }
 0x5fe   : > { %2221 = vmatpush3.bf16.msra.mxu1 %v2381_v62 }
 0x5ff   : > { %2222 = vmatprep.subr.bf16.mxu1 %v2727_v2 }
 0x602   : > { %2223 = vmatpush3.bf16.msra.mxu1 %v2382_v15 }
 0x6c8   : > { %v1640_v47 = vpop.f32.mrb[16].mxu1 }
 0x6c9   : > { %v1641_v48 = vadd.f32 %v1640_v47, %v1601_v46  ;;  %v2206_v6 = vpop.f32.mrb[17].mxu1 }
 0x6ca   : > { %v1643_v49 = vpop.f32.mrb[18].mxu1 }
 0x6cb   : > { %v2207_v50 = vpop.f32.mrb[19].mxu1  ;;  %v1646_v51 = vadd.f32 %v1641_v48, %v3190_v4  ;;  %v2377_v4 = vld [vmem:[%s399_s10] sm:$0xff]   ;;  %s1856_s10 = sshll.u32 %s3181_s11, 4  ;;  %s3387_s10 = int_to_ptr.vmem [resolvable:$true] %s1856_s10 }
 0x6cc   : > { %2209 = vmatpush3.bf16.msra.mxu0 %v2377_v4  ;;  %s2583_s16 = scalar_lea.vmem %s3387_s10, 128  ;;  %p2590_p2 = scmp.lt.s32.totalorder %s3387_s10, %s2588_s8 }
 0x6cd   : > { %v1647_v52 = vsel %vm506_vm2, %v1646_v51, 0.0  ;;  %2210 = vmatprep.subr.bf16.mxu0 %v2727_v2  ;;  %p2584_p9 = scmp.ne.s32.totalorder %s3387_s10, %s2583_s16 }
 0x6ce   : > { %1648 = vadd.xlane.f32.xlu0 %v1647_v52 }
 0x6cf   : > { %p2585_p13 = pnand %p2584_p9, %p3535_p6 }
 0x6d0   : > { %2211 = vmatpush3.bf16.msra.mxu0 %v2378_v59 }
 0x6d1   : > { %p2586_p12 = pneg %p2585_p13 }
 0x6e4   : > { %1668 = vrot.lane.b32.xlu0 %v2096_v53, %s2731_s17 }
 0x75b   : > { %v1649_v54 = vpop.xlane.xlu0 %1648 }
 0x75c   : > { %v1651_v55 = vmul.f32 0.03125, %v1649_v54 }
 0x75e   : > { %v1652_v56 = vsub.f32 %v1646_v51, %v1651_v55 }
 0x75f   : > { %v1669_v7 = vpop.permute.xlu0 %1668 }
 0x760   : > { %v1653_v57 = vmul.f32 %v1652_v56, %v1652_v56 }
 0x762   : > { %v1654_v58 = vsel %vm506_vm2, %v1653_v57, 0.0 }
 0x763   : > { %1655 = vadd.xlane.f32.xlu1 %v1654_v58 }
 0x774   : > { %1689 = vrot.lane.b32.xlu1 %v2096_v53, %s2733_s3 }
 0x7f0   : > { %v1656_v63 = vpop.xlane.xlu1 %1655 }
 0x7f1   : > { %v1657_v0 = vmul.f32 0.03125, %v1656_v63 }
 0x7f3   : > { %v1658_v1 = vadd.f32 1e-05, %v1657_v0 }
 0x7f4   : > { %v1690_v16 = vpop.permute.xlu1 %1689 }
 0x7f5   : > { %2399 = vrsqrt.f32 %v1658_v1 }
 0x7ff   : > { %v2400_v3 = vpop.eup %2399 }
 0x800   : > { %v1660_v5 = vmul.f32 %v2400_v3, %v1652_v56 }
 0x802   : > { %v1667_v8 = vmul.f32 %v2096_v53, %v1660_v5 }
 0x804   : > { %v1671_v11 = vadd.f32 %v1669_v7, %v1667_v8 }
 0x806   : > { %v1672_v12 = vpack.c.bf16 %v1671_v11, %v1671_v11 }
 0x808   : > { %2213 = vmatmul.mubr.msk.bf16.vlgmr.msra.gmra.mrb[20].mxu0 %vm506_vm2, %v1672_v12 }
 0x8db   : > { %v1729_v17 = vpop.f32.mrb[20].mxu0 }
 0x8dc   : > { %v1730_v18 = vadd.f32 %v1729_v17, %v1690_v16  ;;  %v2214_v19 = vpop.f32.mrb[21].mxu0 }
 0x8dd   : > { %v1732_v2 = vpop.f32.mrb[22].mxu0 }
 0x8de   : > { %v1735_v20 = vmax.f32 %v1730_v18, 0.0  ;;  %v2215_v21 = vpop.f32.mrb[23].mxu0 }
 0x8e0   : > { %v1736_v22 = vpack.c.bf16 %v1735_v20, %v1735_v20 }
 0x8e2   : > { %2225 = vmatmul.mubr.msk.bf16.vlgmr.msra.gmra.mrb[20].mxu1 %vm1775_vm7, %v1736_v22 }
 0x9b5   : > { %v1813_v24 = vpop.f32.mrb[20].mxu1 }
 0x9b6   : > { %v1814_v25 = vadd.f32 %v2100_v23, %v1813_v24  ;;  %v2226_v27 = vpop.f32.mrb[21].mxu1 }
 0x9b7   : > { %v1816_v28 = vpop.f32.mrb[22].mxu1 }
 0x9b8   : > { %v2227_v29 = vpop.f32.mrb[23].mxu1  ;;  %v1819_v13 = vadd.f32 %v1814_v25, %v1671_v11 }
 0x9ba   : > { %v1820_v30 = vsel %vm506_vm2, %v1819_v13, 0.0 }
 0x9bb   : > { %1821 = vadd.xlane.f32.xlu0 %v1820_v30 }
 0x9d1   : > { %1833 = vrot.lane.b32.xlu0 %v2100_v23, %s2731_s17  ;;  %s2589_s17 = scalar_lea.vmem %s2588_s8, 256 }
 0x9d2   : > { %p2591_p10 = scmp.lt.s32.totalorder %s2589_s17, %s2583_s16 }
 0x9d4   : > { %p2592_p5 = por %p2591_p10, %p2590_p2 }
 0x9d6   : > { %p2593_p3 = pnand %p2592_p5, %p2586_p12 }
 0xa48   : > { %v1822_v14 = vpop.xlane.xlu0 %1821 }
 0xa49   : > { %v1823_v31 = vmul.f32 0.03125, %v1822_v14 }
 0xa4b   : > { %v1824_v32 = vsub.f32 %v1819_v13, %v1823_v31 }
 0xa4c   : > { %v1834_v38 = vpop.permute.xlu0 %1833 }
 0xa4d   : > { %v1825_v34 = vmul.f32 %v1824_v32, %v1824_v32 }
 0xa4f   : > { %v1826_v35 = vsel %vm506_vm2, %v1825_v34, 0.0 }
 0xa50   : > { %1827 = vadd.xlane.f32.xlu1 %v1826_v35 }
 0xa61   : > { %1837 = vrot.lane.b32.xlu1 %v2100_v23, %s2733_s3 }
 0xadd   : > { %v1828_v9 = vpop.xlane.xlu1 %1827 }
 0xade   : > { %v1829_v10 = vmul.f32 0.03125, %v1828_v9 }
 0xae0   : > { %v1830_v36 = vadd.f32 1e-05, %v1829_v10 }
 0xae1   : > { %v1838_v40 = vpop.permute.xlu1 %1837 }
 0xae2   : > { %2401 = vrsqrt.f32 %v1830_v36 }
 0xaec   : > { %v2402_v37 = vpop.eup %2401 }
 0xaed   : > { %v1832_v39 = vmul.f32 %v2402_v37, %v1824_v32 }
 0xaef   : > { %v1836_v26 = vmul.f32 %v1834_v38, %v1832_v39 }
 0xaf1   : > { %v1840_v41 = vadd.f32 %v1838_v40, %v1836_v26 }
 0xaf3   : > { %1841 = vst.msk [vmem:[%s3181_s11] sm:$0xff] %vm506_vm2, %v1840_v41 }
 0xaf4   : > { %2596 = shalt.err (!%p2593_p3)
}
 0xaf5   : > { %s2597_s5 = scalar_lea.hbm %s3385_s1, 128  ;;  %s2601_s3 = scalar_lea.hbm %s3534_s14, 256 }
 0xaf6   : > { %p2598_p0 = scmp.ne.s32.totalorder %s3385_s1, %s2597_s5  ;;  %p2602_p7 = scmp.lt.u32.totalorder %s3385_s1, %s3534_s14 }
 0xaf7   : > { %p2603_p1 = scmp.lt.u32.totalorder %s2601_s3, %s2597_s5  ;;  %p2605_p9 = scmp.lt.u32.totalorder %s2597_s5, %s3385_s1 }
 0xaf8   : > { %p2599_p11 = pnand %p2598_p0, %p3535_p6 }
 0xaf9   : > { %p2604_p4 = por %p2603_p1, %p2602_p7 }
 0xafa   : > { %p2600_p8 = pneg %p2599_p11 }
 0xafb   : > { %p2606_p13 = por %p2605_p9, %p2604_p4 }
 0xafd   : > { %p2607_p12 = pnand %p2606_p13, %p2600_p8 }
 0xaff   : > { %2610 = shalt.err (!%p2607_p12)
}
 0xb00   : > { %2243 = dma.vmem_to_hbm [thread:$0]  (%p3535_p6), %s3387_s10, 128, %s3385_s1, %s1843_s13  }
 0xb01 PF: > { %p2269_p2 = scmp.ge.s32.totalorder %s2717_s7, 2  ;;  %s1868_s22 = sand.u32 1, %s2689_s24  }
 0xb02   : > { %p3536_p10 = scmp.ne.s32.totalorder %s3517_s15, 0  ;;  %s1869_s6 = scalar_lea.sflag [#allocation4], %s1868_s22 }
 0xb04   : > { %p2265_p5 = pnand %p2269_p2, %p3536_p10 }
 0xb06   : > { %2672 = dma.done.wait (!%p2265_p5), %s1869_s6, 128  }
 0xb07   : > { %2674 = vsyncadd (!%p2265_p5), %s1869_s6, 4294967168  ;;  %s31_s7 = sadd.s32 1, %s2717_s7   ;;  %s3537_s21 = sld [smem:[#allocation19_spill]] }
 0xb08   : > { %p28_p3 = scmp.ge.s32.totalorder %s31_s7, 6   ;;  %s3538_s18 = sld [smem:[#allocation31_spill]] }
 0xb09   : > { %s3539_s27 = sld [smem:[#allocation20_spill]]  ;;  %s3540_s26 = sld [smem:[#allocation32_spill]] }
 0xb0a   : > { %s3541_s28 = sld [smem:[#allocation23_spill]]  ;;  %s3542_s9 = sld [smem:[#allocation27_spill]] }
 0xb0b   : > { %s3543_s30 = sld [smem:[#allocation28_spill]]  ;;  %s3544_s22 = smov %s2685_s23 }
 0xb0c   : > { %s3546_s24 = smov %s2693_s25  ;;  %30 = sbr.rel (!%p28_p3) target bundleno = 20 (0x14), region = 154 }
 0xb0e   : > { %s3545_s23 = smov %s3538_s18 }
 0xb0f   : > { %s3547_s25 = smov %s3539_s27  ;;  %s3548_s27 = smov %s2709_s29 }
 0xb10   : > { %s3549_s29 = smov %s3542_s9 }
 0xb13   :  { %1874 = vsyncpa [#allocation3], 1 }
 0xb14   :  { %1876 = vsyncpa [#allocation3 + $0x1], 1 }
 0xb15   :  { %1877 = vsyncpa [#allocation6], 1 }
 0xb16   :  { %1879 = vsyncpa [#allocation6 + $0x1], 1 }
 0xb17   :  { %1880 = vsyncpa [#allocation9], 1 }
 0xb18   :  { %1882 = vsyncpa [#allocation9 + $0x1], 1 }
 0xb19   :  { %1883 = vsyncpa [#allocation12], 1 }
 0xb1a   :  { %1885 = vsyncpa [#allocation12 + $0x1], 1 }
 0xb1b   :  { %1886 = vsyncpa [#allocation4], 1 }
 0xb1c   :  { %1888 = vsyncpa [#allocation4 + $0x1], 1 }

</bundles_post_ra>
